<compile_context>
chip_gen: v7x
topology: tpu7x:2x2x1
jax: 0.10.0
libtpu: 0.0.40
codegen_flags: <defaults>
</compile_context>

<pallas_src>
import math
from functools import partial

import jax
import jax.numpy as jnp
import numpy as np
from jax import lax
from jax.experimental import pallas as pl
from jax.experimental.pallas import tpu as pltpu

EPS = 1e-5


# ------------------------------ fused kernel -------------------------------

def _make_fused_block_kernel(N, H, W, Cin, Cout, stride, equal_in_out):
    """Builds the fused BasicBlock kernel for a fixed (shape, stride, variant)."""
    Ho = (H - 1) // stride + 1
    Wo = (W - 1) // stride + 1
    M = N * Ho * Wo            # matmul rows, ordered (ow, n, oh)
    R = N * Ho                 # rows per output column-block
    n_parts = 1 if stride == 1 else 4

    def kernel(*refs):
        xs = list(refs[:n_parts])
        i = n_parts
        s1_ref, b1_ref, w1_ref, s2_ref, b2_ref, w2_ref = refs[i:i + 6]
        i += 6
        ws_ref = None
        if not equal_in_out:
            ws_ref = refs[i]
            i += 1
        o_ref = refs[i]
        i += 1
        pads = list(refs[i:i + n_parts])
        i += n_parts
        col1_ref, pad2_ref, col2_ref = refs[i:i + 3]

        # ---- stage 1: BN1 + ReLU (VPU) + zero-padded copy into VMEM scratch ----
        for p_ref in pads:
            p_ref[...] = jnp.zeros_like(p_ref)

        if stride == 1:
            a1 = jnp.maximum(xs[0][...] * s1_ref[...] + b1_ref[...], 0.0)  # (W*N*H, Cin)
            pads[0][1:W + 1, :, 1:H + 1, :] = a1.reshape(W, N, H, Cin)

            def tap1(kh, kw):
                return pads[0][kw:kw + Wo, :, kh:kh + Ho, :]
        else:  # stride == 2: phases (p, q) = parity on the zero-padded grid
            H2, W2 = H // 2, W // 2
            for p in range(2):
                for q in range(2):
                    a1 = jnp.maximum(
                        xs[2 * p + q][...] * s1_ref[...] + b1_ref[...], 0.0)
                    pads[2 * p + q][(1 - q):(1 - q) + W2, :,
                                    (1 - p):(1 - p) + H2, :] = (
                        a1.reshape(W2, N, H2, Cin))

            def tap1(kh, kw):
                p, a = kh % 2, kh // 2
                q, b = kw % 2, kw // 2
                return pads[2 * p + q][b:b + Wo, :, a:a + Ho, :]

        # ---- stage 2: conv1 as a single (M, 9*Cin) @ (9*Cin, Cout) MXU matmul ----
        center = None
        for kh in range(3):
            for kw in range(3):
                t = kh * 3 + kw
                patch = tap1(kh, kw).reshape(M, Cin)      # rows ordered (ow, n, oh)
                if t == 4:
                    center = patch                        # strided act1 == 1x1-shortcut input
                col1_ref[:, t * Cin:(t + 1) * Cin] = patch
        h1 = jnp.dot(col1_ref[...], w1_ref[...], preferred_element_type=jnp.float32)

        # ---- stage 3: BN2 + ReLU (rides in MXU slack), pad, conv2 ----
        a2 = jnp.maximum(h1 * s2_ref[...] + b2_ref[...], 0.0)            # (M, Cout)
        pad2_ref[...] = jnp.zeros_like(pad2_ref)
        pad2_ref[1:Wo + 1, :, 1:Ho + 1, :] = a2.reshape(Wo, N, Ho, Cout)
        for kh in range(3):
            for kw in range(3):
                t = kh * 3 + kw
                col2_ref[:, t * Cout:(t + 1) * Cout] = (
                    pad2_ref[kw:kw + Wo, :, kh:kh + Ho, :].reshape(M, Cout))
        y = jnp.dot(col2_ref[...], w2_ref[...], preferred_element_type=jnp.float32)

        # ---- stage 4: shortcut add ----
        if equal_in_out:
            y = y + xs[0][...]                            # identity shortcut (original x)
        else:
            y = y + jnp.dot(center, ws_ref[...], preferred_element_type=jnp.float32)

        # ---- stage 5: lane-dense output (N*Ho, Wo*Cout); column block ow holds the
        #      (n, oh) slab for that ow (y rows are (ow, n, oh)-ordered) ----
        y = y.astype(o_ref.dtype)
        for ow in range(Wo):
            o_ref[:, ow * Cout:(ow + 1) * Cout] = y[ow * R:(ow + 1) * R, :]

    return kernel


# ------------------------------ block wrapper ------------------------------

@partial(jax.jit, static_argnums=(2, 3, 4, 5))
def basic_block_forward(x_nchw, params, in_planes, out_planes, stride, drop_rate=0.0):
    # TODO(synk): F.dropout path (dropRate > 0, training-mode RNG) not implemented;
    # the module default dropRate=0.0 is assumed.
    assert drop_rate == 0.0
    assert stride in (1, 2)
    equal_in_out = in_planes == out_planes
    assert (not equal_in_out) or stride == 1, \
        "equalInOut with stride>1 is shape-invalid (as in the PyTorch module)"

    N, Cin, H, W = x_nchw.shape
    assert Cin == in_planes
    Cout = out_planes
    Ho = (H - 1) // stride + 1
    Wo = (W - 1) // stride + 1
    M = N * Ho * Wo

    # --- wrapper-side layout glue only (no compute) ---
    # Activations are presented W-major: rows = (w, n, h), lanes = channels.
    if stride == 1:
        x_parts = [jnp.transpose(x_nchw, (3, 0, 2, 1)).reshape(W * N * H, Cin)]
    else:
        assert H % 2 == 0 and W % 2 == 0
        # phase (p, q) holds rows of h-parity (1-p) and w-parity (1-q) of x
        x_parts = []
        for p in range(2):
            for q in range(2):
                xpq = x_nchw[:, :, (1 - p)::2, (1 - q)::2]       # (N, Cin, H/2, W/2)
                x_parts.append(jnp.transpose(xpq, (3, 0, 2, 1)).reshape(-1, Cin))

    # BatchNorm (inference) folded to per-channel scale / bias.
    def fold_bn(bn, c):
        g, b, m, v = bn
        inv = g / jnp.sqrt(v + EPS)
        return inv.reshape(1, c), (b - m * inv).reshape(1, c)

    s1, o1 = fold_bn(params["bn1"], Cin)
    s2, o2 = fold_bn(params["bn2"], Cout)

    # conv weights: OIHW -> im2col layout (kh*kw*cin, cout)
    w1 = jnp.transpose(params["conv1_w"], (2, 3, 1, 0)).reshape(9 * Cin, Cout)
    w2 = jnp.transpose(params["conv2_w"], (2, 3, 1, 0)).reshape(9 * Cout, Cout)

    args = x_parts + [s1, o1, w1, s2, o2, w2]
    if not equal_in_out:
        args.append(jnp.transpose(params["convs_w"].reshape(Cout, Cin), (1, 0)))

    if stride == 1:
        pad_scratch = [pltpu.VMEM((W + 2, N, H + 2, Cin), jnp.float32)]
    else:
        pad_scratch = [pltpu.VMEM((W // 2 + 1, N, H // 2 + 1, Cin), jnp.float32)] * 4

    kernel = _make_fused_block_kernel(N, H, W, Cin, Cout, stride, equal_in_out)
    # NOTE: at real WideResNet sizes the M (= N*Ho*Wo) rows would be tiled over a
    # 'parallel' grid axis with BlockSpecs; at these test sizes one fused invocation
    # removes all per-step overhead and keeps every intermediate in VMEM.
    out2d = pl.pallas_call(
        kernel,
        out_shape=jax.ShapeDtypeStruct((N * Ho, Wo * Cout), x_nchw.dtype),
        scratch_shapes=pad_scratch + [
            pltpu.VMEM((M, 9 * Cin), jnp.float32),               # conv1 im2col matrix
            pltpu.VMEM((Wo + 2, N, Ho + 2, Cout), jnp.float32),  # zero-padded act2
            pltpu.VMEM((M, 9 * Cout), jnp.float32),              # conv2 im2col matrix
        ],
    )(*args)

    out = out2d.reshape(N, Ho, Wo, Cout)
    return jnp.transpose(out, (0, 3, 1, 2))                      # back to NCHW


# ----------------------------- parameter init ------------------------------

def init_basic_block_params(key, in_planes, out_planes):
    ks = jax.random.split(key, 11)

    def conv_w(k, cout, cin, kh, kw):
        std = math.sqrt(2.0 / (kh * kw * cout))
        return std * jax.random.normal(k, (cout, cin, kh, kw), jnp.float32)  # OIHW

    def bn(k0, k1, k2, k3, c):
        gamma = 1.0 + 0.1 * jax.random.normal(k0, (c,), jnp.float32)
        beta = 0.1 * jax.random.normal(k1, (c,), jnp.float32)
        mean = 0.1 * jax.random.normal(k2, (c,), jnp.float32)
        var = jnp.abs(1.0 + 0.1 * jax.random.normal(k3, (c,), jnp.float32))
        return (gamma, beta, mean, var)

    params = {
        "bn1": bn(ks[0], ks[1], ks[2], ks[3], in_planes),
        "conv1_w": conv_w(ks[4], out_planes, in_planes, 3, 3),
        "bn2": bn(ks[5], ks[6], ks[7], ks[8], out_planes),
        "conv2_w": conv_w(ks[9], out_planes, out_planes, 3, 3),
    }
    if in_planes != out_planes:
        params["convs_w"] = conv_w(ks[10], out_planes, in_planes, 1, 1)
    return params


# ---------------------------- pure-JAX reference ---------------------------

def _ref_bn_relu(x, bn):
    g, b, m, v = bn
    inv = (g / jnp.sqrt(v + EPS))[None, :, None, None]
    y = (x - m[None, :, None, None]) * inv + b[None, :, None, None]
    return jnp.maximum(y, 0.0)


def _ref_conv(x, w, stride, pad):
    return lax.conv_general_dilated(
        x, w, (stride, stride), ((pad, pad), (pad, pad)),
        dimension_numbers=("NCHW", "OIHW", "NCHW"),
        precision=lax.Precision.HIGHEST)


def ref_basic_block(x, params, in_planes, out_planes, stride):
    equal = in_planes == out_planes
    act1 = _ref_bn_relu(x, params["bn1"])
    out = _ref_conv(act1, params["conv1_w"], stride, 1)
    out = _ref_bn_relu(out, params["bn2"])
    out = _ref_conv(out, params["conv2_w"], 1, 1)
    shortcut = x if equal else _ref_conv(act1, params["convs_w"], stride, 0)
    return shortcut + out


# ----------------------------------- main ----------------------------------

if __name__ == "__main__":
    key = jax.random.PRNGKey(0)
    k_x1, k_x2, k_p1, k_p2 = jax.random.split(key, 4)

    # Block A: equalInOut=True (identity shortcut), stride 1.
    inA, outA, sA = 16, 16, 1
    xA = jax.random.normal(k_x1, (2, inA, 8, 8), jnp.float32)     # NCHW
    pA = init_basic_block_params(k_p1, inA, outA)
    yA = jax.block_until_ready(basic_block_forward(xA, pA, inA, outA, sA, 0.0))
    rA = ref_basic_block(xA, pA, inA, outA, sA)
    np.testing.assert_allclose(np.asarray(yA), np.asarray(rA), rtol=2e-2, atol=2e-2)
    assert yA.shape == (2, 16, 8, 8)

    # Block B: equalInOut=False (1x1 conv shortcut), stride 2.
    inB, outB, sB = 16, 32, 2
    xB = jax.random.normal(k_x2, (2, inB, 8, 8), jnp.float32)     # NCHW
    pB = init_basic_block_params(k_p2, inB, outB)
    yB = jax.block_until_ready(basic_block_forward(xB, pB, inB, outB, sB, 0.0))
    rB = ref_basic_block(xB, pB, inB, outB, sB)
    np.testing.assert_allclose(np.asarray(yB), np.asarray(rB), rtol=2e-2, atol=2e-2)
    assert yB.shape == (2, 32, 4, 4)

    print("KERNEL_OK")
</pallas_src>

<mosaic_0001>
module attributes {stable_mosaic.version = 11 : i64} {
  func.func @kernel(%arg0: memref<128x16xf32, #tpu.memory_space<vmem>>, %arg1: memref<1x16xf32, #tpu.memory_space<vmem>>, %arg2: memref<1x16xf32, #tpu.memory_space<vmem>>, %arg3: memref<144x16xf32, #tpu.memory_space<vmem>>, %arg4: memref<1x16xf32, #tpu.memory_space<vmem>>, %arg5: memref<1x16xf32, #tpu.memory_space<vmem>>, %arg6: memref<144x16xf32, #tpu.memory_space<vmem>>, %arg7: memref<16x128xf32, #tpu.memory_space<vmem>>, %arg8: memref<10x2x10x16xf32, #tpu.memory_space<vmem>>, %arg9: memref<128x144xf32, #tpu.memory_space<vmem>>, %arg10: memref<10x2x10x16xf32, #tpu.memory_space<vmem>>, %arg11: memref<128x144xf32, #tpu.memory_space<vmem>>) attributes {dimension_semantics = [], scalar_prefetch = 0 : i64, scratch_operands = 4 : i64, tpu.core_type = #tpu.core_type<tc>} {
    %cst = arith.constant 0.000000e+00 : f32
    %0 = vector.broadcast %cst : f32 to vector<10x2x10x16xf32>
    %c0 = arith.constant 0 : index
    %c0_0 = arith.constant 0 : index
    %c0_1 = arith.constant 0 : index
    %c0_2 = arith.constant 0 : index
    %1 = vector.load %arg8[%c0, %c0_0, %c0_1, %c0_2] : memref<10x2x10x16xf32, #tpu.memory_space<vmem>>, vector<10x2x10x16xf32>
    tpu.vector_store %arg8[%c0, %c0_0, %c0_1, %c0_2], %0 {strides = array<i32>} : memref<10x2x10x16xf32, #tpu.memory_space<vmem>>, vector<10x2x10x16xf32>,
    %c0_3 = arith.constant 0 : index
    %c0_4 = arith.constant 0 : index
    %2 = vector.load %arg0[%c0_3, %c0_4] : memref<128x16xf32, #tpu.memory_space<vmem>>, vector<128x16xf32>
    %c0_5 = arith.constant 0 : index
    %c0_6 = arith.constant 0 : index
    %3 = vector.load %arg1[%c0_5, %c0_6] : memref<1x16xf32, #tpu.memory_space<vmem>>, vector<1x16xf32>
    %4 = vector.broadcast %3 : vector<1x16xf32> to vector<128x16xf32>
    %5 = arith.mulf %2, %4 : vector<128x16xf32>
    %c0_7 = arith.constant 0 : index
    %c0_8 = arith.constant 0 : index
    %6 = vector.load %arg2[%c0_7, %c0_8] : memref<1x16xf32, #tpu.memory_space<vmem>>, vector<1x16xf32>
    %7 = vector.broadcast %6 : vector<1x16xf32> to vector<128x16xf32>
    %8 = arith.addf %5, %7 : vector<128x16xf32>
    %cst_9 = arith.constant 0.000000e+00 : f32
    %9 = vector.broadcast %cst_9 : f32 to vector<128x16xf32>
    %10 = arith.maximumf %8, %9 : vector<128x16xf32>
    %11 = vector.shape_cast %10 : vector<128x16xf32> to vector<8x2x8x16xf32>
    %c1 = arith.constant 1 : index
    %c0_10 = arith.constant 0 : index
    %c1_11 = arith.constant 1 : index
    %c0_12 = arith.constant 0 : index
    %12 = vector.load %arg8[%c1, %c0_10, %c1_11, %c0_12] : memref<10x2x10x16xf32, #tpu.memory_space<vmem>>, vector<8x2x8x16xf32>
    tpu.vector_store %arg8[%c1, %c0_10, %c1_11, %c0_12], %11 {strides = array<i32>} : memref<10x2x10x16xf32, #tpu.memory_space<vmem>>, vector<8x2x8x16xf32>,
    %c0_13 = arith.constant 0 : index
    %c0_14 = arith.constant 0 : index
    %c0_15 = arith.constant 0 : index
    %c0_16 = arith.constant 0 : index
    %13 = vector.load %arg8[%c0_13, %c0_14, %c0_15, %c0_16] : memref<10x2x10x16xf32, #tpu.memory_space<vmem>>, vector<8x2x8x16xf32>
    %14 = vector.shape_cast %13 : vector<8x2x8x16xf32> to vector<128x16xf32>
    %c0_17 = arith.constant 0 : index
    %c0_18 = arith.constant 0 : index
    %15 = vector.load %arg9[%c0_17, %c0_18] : memref<128x144xf32, #tpu.memory_space<vmem>>, vector<128x16xf32>
    tpu.vector_store %arg9[%c0_17, %c0_18], %14 {strides = array<i32>} : memref<128x144xf32, #tpu.memory_space<vmem>>, vector<128x16xf32>,
    %c1_19 = arith.constant 1 : index
    %c0_20 = arith.constant 0 : index
    %c0_21 = arith.constant 0 : index
    %c0_22 = arith.constant 0 : index
    %16 = vector.load %arg8[%c1_19, %c0_20, %c0_21, %c0_22] : memref<10x2x10x16xf32, #tpu.memory_space<vmem>>, vector<8x2x8x16xf32>
    %17 = vector.shape_cast %16 : vector<8x2x8x16xf32> to vector<128x16xf32>
    %c0_23 = arith.constant 0 : index
    %c16 = arith.constant 16 : index
    %18 = vector.load %arg9[%c0_23, %c16] : memref<128x144xf32, #tpu.memory_space<vmem>>, vector<128x16xf32>
    tpu.vector_store %arg9[%c0_23, %c16], %17 {strides = array<i32>} : memref<128x144xf32, #tpu.memory_space<vmem>>, vector<128x16xf32>,
    %c2 = arith.constant 2 : index
    %c0_24 = arith.constant 0 : index
    %c0_25 = arith.constant 0 : index
    %c0_26 = arith.constant 0 : index
    %19 = vector.load %arg8[%c2, %c0_24, %c0_25, %c0_26] : memref<10x2x10x16xf32, #tpu.memory_space<vmem>>, vector<8x2x8x16xf32>
    %20 = vector.shape_cast %19 : vector<8x2x8x16xf32> to vector<128x16xf32>
    %c0_27 = arith.constant 0 : index
    %c32 = arith.constant 32 : index
    %21 = vector.load %arg9[%c0_27, %c32] : memref<128x144xf32, #tpu.memory_space<vmem>>, vector<128x16xf32>
    tpu.vector_store %arg9[%c0_27, %c32], %20 {strides = array<i32>} : memref<128x144xf32, #tpu.memory_space<vmem>>, vector<128x16xf32>,
    %c0_28 = arith.constant 0 : index
    %c0_29 = arith.constant 0 : index
    %c1_30 = arith.constant 1 : index
    %c0_31 = arith.constant 0 : index
    %22 = vector.load %arg8[%c0_28, %c0_29, %c1_30, %c0_31] : memref<10x2x10x16xf32, #tpu.memory_space<vmem>>, vector<8x2x8x16xf32>
    %23 = vector.shape_cast %22 : vector<8x2x8x16xf32> to vector<128x16xf32>
    %c0_32 = arith.constant 0 : index
    %c48 = arith.constant 48 : index
    %24 = vector.load %arg9[%c0_32, %c48] : memref<128x144xf32, #tpu.memory_space<vmem>>, vector<128x16xf32>
    tpu.vector_store %arg9[%c0_32, %c48], %23 {strides = array<i32>} : memref<128x144xf32, #tpu.memory_space<vmem>>, vector<128x16xf32>,
    %c1_33 = arith.constant 1 : index
    %c0_34 = arith.constant 0 : index
    %c1_35 = arith.constant 1 : index
    %c0_36 = arith.constant 0 : index
    %25 = vector.load %arg8[%c1_33, %c0_34, %c1_35, %c0_36] : memref<10x2x10x16xf32, #tpu.memory_space<vmem>>, vector<8x2x8x16xf32>
    %26 = vector.shape_cast %25 : vector<8x2x8x16xf32> to vector<128x16xf32>
    %c0_37 = arith.constant 0 : index
    %c64 = arith.constant 64 : index
    %27 = vector.load %arg9[%c0_37, %c64] : memref<128x144xf32, #tpu.memory_space<vmem>>, vector<128x16xf32>
    tpu.vector_store %arg9[%c0_37, %c64], %26 {strides = array<i32>} : memref<128x144xf32, #tpu.memory_space<vmem>>, vector<128x16xf32>,
    %c2_38 = arith.constant 2 : index
    %c0_39 = arith.constant 0 : index
    %c1_40 = arith.constant 1 : index
    %c0_41 = arith.constant 0 : index
    %28 = vector.load %arg8[%c2_38, %c0_39, %c1_40, %c0_41] : memref<10x2x10x16xf32, #tpu.memory_space<vmem>>, vector<8x2x8x16xf32>
    %29 = vector.shape_cast %28 : vector<8x2x8x16xf32> to vector<128x16xf32>
    %c0_42 = arith.constant 0 : index
    %c80 = arith.constant 80 : index
    %30 = vector.load %arg9[%c0_42, %c80] : memref<128x144xf32, #tpu.memory_space<vmem>>, vector<128x16xf32>
    tpu.vector_store %arg9[%c0_42, %c80], %29 {strides = array<i32>} : memref<128x144xf32, #tpu.memory_space<vmem>>, vector<128x16xf32>,
    %c0_43 = arith.constant 0 : index
    %c0_44 = arith.constant 0 : index
    %c2_45 = arith.constant 2 : index
    %c0_46 = arith.constant 0 : index
    %31 = vector.load %arg8[%c0_43, %c0_44, %c2_45, %c0_46] : memref<10x2x10x16xf32, #tpu.memory_space<vmem>>, vector<8x2x8x16xf32>
    %32 = vector.shape_cast %31 : vector<8x2x8x16xf32> to vector<128x16xf32>
    %c0_47 = arith.constant 0 : index
    %c96 = arith.constant 96 : index
    %33 = vector.load %arg9[%c0_47, %c96] : memref<128x144xf32, #tpu.memory_space<vmem>>, vector<128x16xf32>
    tpu.vector_store %arg9[%c0_47, %c96], %32 {strides = array<i32>} : memref<128x144xf32, #tpu.memory_space<vmem>>, vector<128x16xf32>,
    %c1_48 = arith.constant 1 : index
    %c0_49 = arith.constant 0 : index
    %c2_50 = arith.constant 2 : index
    %c0_51 = arith.constant 0 : index
    %34 = vector.load %arg8[%c1_48, %c0_49, %c2_50, %c0_51] : memref<10x2x10x16xf32, #tpu.memory_space<vmem>>, vector<8x2x8x16xf32>
    %35 = vector.shape_cast %34 : vector<8x2x8x16xf32> to vector<128x16xf32>
    %c0_52 = arith.constant 0 : index
    %c112 = arith.constant 112 : index
    %36 = vector.load %arg9[%c0_52, %c112] : memref<128x144xf32, #tpu.memory_space<vmem>>, vector<128x16xf32>
    tpu.vector_store %arg9[%c0_52, %c112], %35 {strides = array<i32>} : memref<128x144xf32, #tpu.memory_space<vmem>>, vector<128x16xf32>,
    %c2_53 = arith.constant 2 : index
    %c0_54 = arith.constant 0 : index
    %c2_55 = arith.constant 2 : index
    %c0_56 = arith.constant 0 : index
    %37 = vector.load %arg8[%c2_53, %c0_54, %c2_55, %c0_56] : memref<10x2x10x16xf32, #tpu.memory_space<vmem>>, vector<8x2x8x16xf32>
    %38 = vector.shape_cast %37 : vector<8x2x8x16xf32> to vector<128x16xf32>
    %c0_57 = arith.constant 0 : index
    %c128 = arith.constant 128 : index
    %39 = vector.load %arg9[%c0_57, %c128] : memref<128x144xf32, #tpu.memory_space<vmem>>, vector<128x16xf32>
    tpu.vector_store %arg9[%c0_57, %c128], %38 {strides = array<i32>} : memref<128x144xf32, #tpu.memory_space<vmem>>, vector<128x16xf32>,
    %c0_58 = arith.constant 0 : index
    %c0_59 = arith.constant 0 : index
    %40 = vector.load %arg9[%c0_58, %c0_59] : memref<128x144xf32, #tpu.memory_space<vmem>>, vector<128x144xf32>
    %c0_60 = arith.constant 0 : index
    %c0_61 = arith.constant 0 : index
    %41 = vector.load %arg3[%c0_60, %c0_61] : memref<144x16xf32, #tpu.memory_space<vmem>>, vector<144x16xf32>
    %cst_62 = arith.constant dense<0.000000e+00> : vector<128x16xf32>
    %42 = tpu.matmul %40, %41, %cst_62 {dimension_numbers = #tpu.dot_dimension_numbers<[1], [0], [0], [1], [0, 0, 1, 1], [], []>} : vector<128x144xf32>, vector<144x16xf32>, vector<128x16xf32> -> vector<128x16xf32>
    %c0_63 = arith.constant 0 : index
    %c0_64 = arith.constant 0 : index
    %43 = vector.load %arg4[%c0_63, %c0_64] : memref<1x16xf32, #tpu.memory_space<vmem>>, vector<1x16xf32>
    %44 = vector.broadcast %43 : vector<1x16xf32> to vector<128x16xf32>
    %45 = arith.mulf %42, %44 : vector<128x16xf32>
    %c0_65 = arith.constant 0 : index
    %c0_66 = arith.constant 0 : index
    %46 = vector.load %arg5[%c0_65, %c0_66] : memref<1x16xf32, #tpu.memory_space<vmem>>, vector<1x16xf32>
    %47 = vector.broadcast %46 : vector<1x16xf32> to vector<128x16xf32>
    %48 = arith.addf %45, %47 : vector<128x16xf32>
    %cst_67 = arith.constant 0.000000e+00 : f32
    %49 = vector.broadcast %cst_67 : f32 to vector<128x16xf32>
    %50 = arith.maximumf %48, %49 : vector<128x16xf32>
    %cst_68 = arith.constant 0.000000e+00 : f32
    %51 = vector.broadcast %cst_68 : f32 to vector<10x2x10x16xf32>
    %c0_69 = arith.constant 0 : index
    %c0_70 = arith.constant 0 : index
    %c0_71 = arith.constant 0 : index
    %c0_72 = arith.constant 0 : index
    %52 = vector.load %arg10[%c0_69, %c0_70, %c0_71, %c0_72] : memref<10x2x10x16xf32, #tpu.memory_space<vmem>>, vector<10x2x10x16xf32>
    tpu.vector_store %arg10[%c0_69, %c0_70, %c0_71, %c0_72], %51 {strides = array<i32>} : memref<10x2x10x16xf32, #tpu.memory_space<vmem>>, vector<10x2x10x16xf32>,
    %53 = vector.shape_cast %50 : vector<128x16xf32> to vector<8x2x8x16xf32>
    %c1_73 = arith.constant 1 : index
    %c0_74 = arith.constant 0 : index
    %c1_75 = arith.constant 1 : index
    %c0_76 = arith.constant 0 : index
    %54 = vector.load %arg10[%c1_73, %c0_74, %c1_75, %c0_76] : memref<10x2x10x16xf32, #tpu.memory_space<vmem>>, vector<8x2x8x16xf32>
    tpu.vector_store %arg10[%c1_73, %c0_74, %c1_75, %c0_76], %53 {strides = array<i32>} : memref<10x2x10x16xf32, #tpu.memory_space<vmem>>, vector<8x2x8x16xf32>,
    %c0_77 = arith.constant 0 : index
    %c0_78 = arith.constant 0 : index
    %c0_79 = arith.constant 0 : index
    %c0_80 = arith.constant 0 : index
    %55 = vector.load %arg10[%c0_77, %c0_78, %c0_79, %c0_80] : memref<10x2x10x16xf32, #tpu.memory_space<vmem>>, vector<8x2x8x16xf32>
    %56 = vector.shape_cast %55 : vector<8x2x8x16xf32> to vector<128x16xf32>
    %c0_81 = arith.constant 0 : index
    %c0_82 = arith.constant 0 : index
    %57 = vector.load %arg11[%c0_81, %c0_82] : memref<128x144xf32, #tpu.memory_space<vmem>>, vector<128x16xf32>
    tpu.vector_store %arg11[%c0_81, %c0_82], %56 {strides = array<i32>} : memref<128x144xf32, #tpu.memory_space<vmem>>, vector<128x16xf32>,
    %c1_83 = arith.constant 1 : index
    %c0_84 = arith.constant 0 : index
    %c0_85 = arith.constant 0 : index
    %c0_86 = arith.constant 0 : index
    %58 = vector.load %arg10[%c1_83, %c0_84, %c0_85, %c0_86] : memref<10x2x10x16xf32, #tpu.memory_space<vmem>>, vector<8x2x8x16xf32>
    %59 = vector.shape_cast %58 : vector<8x2x8x16xf32> to vector<128x16xf32>
    %c0_87 = arith.constant 0 : index
    %c16_88 = arith.constant 16 : index
    %60 = vector.load %arg11[%c0_87, %c16_88] : memref<128x144xf32, #tpu.memory_space<vmem>>, vector<128x16xf32>
    tpu.vector_store %arg11[%c0_87, %c16_88], %59 {strides = array<i32>} : memref<128x144xf32, #tpu.memory_space<vmem>>, vector<128x16xf32>,
    %c2_89 = arith.constant 2 : index
    %c0_90 = arith.constant 0 : index
    %c0_91 = arith.constant 0 : index
    %c0_92 = arith.constant 0 : index
    %61 = vector.load %arg10[%c2_89, %c0_90, %c0_91, %c0_92] : memref<10x2x10x16xf32, #tpu.memory_space<vmem>>, vector<8x2x8x16xf32>
    %62 = vector.shape_cast %61 : vector<8x2x8x16xf32> to vector<128x16xf32>
    %c0_93 = arith.constant 0 : index
    %c32_94 = arith.constant 32 : index
    %63 = vector.load %arg11[%c0_93, %c32_94] : memref<128x144xf32, #tpu.memory_space<vmem>>, vector<128x16xf32>
    tpu.vector_store %arg11[%c0_93, %c32_94], %62 {strides = array<i32>} : memref<128x144xf32, #tpu.memory_space<vmem>>, vector<128x16xf32>,
    %c0_95 = arith.constant 0 : index
    %c0_96 = arith.constant 0 : index
    %c1_97 = arith.constant 1 : index
    %c0_98 = arith.constant 0 : index
    %64 = vector.load %arg10[%c0_95, %c0_96, %c1_97, %c0_98] : memref<10x2x10x16xf32, #tpu.memory_space<vmem>>, vector<8x2x8x16xf32>
    %65 = vector.shape_cast %64 : vector<8x2x8x16xf32> to vector<128x16xf32>
    %c0_99 = arith.constant 0 : index
    %c48_100 = arith.constant 48 : index
    %66 = vector.load %arg11[%c0_99, %c48_100] : memref<128x144xf32, #tpu.memory_space<vmem>>, vector<128x16xf32>
    tpu.vector_store %arg11[%c0_99, %c48_100], %65 {strides = array<i32>} : memref<128x144xf32, #tpu.memory_space<vmem>>, vector<128x16xf32>,
    %c1_101 = arith.constant 1 : index
    %c0_102 = arith.constant 0 : index
    %c1_103 = arith.constant 1 : index
    %c0_104 = arith.constant 0 : index
    %67 = vector.load %arg10[%c1_101, %c0_102, %c1_103, %c0_104] : memref<10x2x10x16xf32, #tpu.memory_space<vmem>>, vector<8x2x8x16xf32>
    %68 = vector.shape_cast %67 : vector<8x2x8x16xf32> to vector<128x16xf32>
    %c0_105 = arith.constant 0 : index
    %c64_106 = arith.constant 64 : index
    %69 = vector.load %arg11[%c0_105, %c64_106] : memref<128x144xf32, #tpu.memory_space<vmem>>, vector<128x16xf32>
    tpu.vector_store %arg11[%c0_105, %c64_106], %68 {strides = array<i32>} : memref<128x144xf32, #tpu.memory_space<vmem>>, vector<128x16xf32>,
    %c2_107 = arith.constant 2 : index
    %c0_108 = arith.constant 0 : index
    %c1_109 = arith.constant 1 : index
    %c0_110 = arith.constant 0 : index
    %70 = vector.load %arg10[%c2_107, %c0_108, %c1_109, %c0_110] : memref<10x2x10x16xf32, #tpu.memory_space<vmem>>, vector<8x2x8x16xf32>
    %71 = vector.shape_cast %70 : vector<8x2x8x16xf32> to vector<128x16xf32>
    %c0_111 = arith.constant 0 : index
    %c80_112 = arith.constant 80 : index
    %72 = vector.load %arg11[%c0_111, %c80_112] : memref<128x144xf32, #tpu.memory_space<vmem>>, vector<128x16xf32>
    tpu.vector_store %arg11[%c0_111, %c80_112], %71 {strides = array<i32>} : memref<128x144xf32, #tpu.memory_space<vmem>>, vector<128x16xf32>,
    %c0_113 = arith.constant 0 : index
    %c0_114 = arith.constant 0 : index
    %c2_115 = arith.constant 2 : index
    %c0_116 = arith.constant 0 : index
    %73 = vector.load %arg10[%c0_113, %c0_114, %c2_115, %c0_116] : memref<10x2x10x16xf32, #tpu.memory_space<vmem>>, vector<8x2x8x16xf32>
    %74 = vector.shape_cast %73 : vector<8x2x8x16xf32> to vector<128x16xf32>
    %c0_117 = arith.constant 0 : index
    %c96_118 = arith.constant 96 : index
    %75 = vector.load %arg11[%c0_117, %c96_118] : memref<128x144xf32, #tpu.memory_space<vmem>>, vector<128x16xf32>
    tpu.vector_store %arg11[%c0_117, %c96_118], %74 {strides = array<i32>} : memref<128x144xf32, #tpu.memory_space<vmem>>, vector<128x16xf32>,
    %c1_119 = arith.constant 1 : index
    %c0_120 = arith.constant 0 : index
    %c2_121 = arith.constant 2 : index
    %c0_122 = arith.constant 0 : index
    %76 = vector.load %arg10[%c1_119, %c0_120, %c2_121, %c0_122] : memref<10x2x10x16xf32, #tpu.memory_space<vmem>>, vector<8x2x8x16xf32>
    %77 = vector.shape_cast %76 : vector<8x2x8x16xf32> to vector<128x16xf32>
    %c0_123 = arith.constant 0 : index
    %c112_124 = arith.constant 112 : index
    %78 = vector.load %arg11[%c0_123, %c112_124] : memref<128x144xf32, #tpu.memory_space<vmem>>, vector<128x16xf32>
    tpu.vector_store %arg11[%c0_123, %c112_124], %77 {strides = array<i32>} : memref<128x144xf32, #tpu.memory_space<vmem>>, vector<128x16xf32>,
    %c2_125 = arith.constant 2 : index
    %c0_126 = arith.constant 0 : index
    %c2_127 = arith.constant 2 : index
    %c0_128 = arith.constant 0 : index
    %79 = vector.load %arg10[%c2_125, %c0_126, %c2_127, %c0_128] : memref<10x2x10x16xf32, #tpu.memory_space<vmem>>, vector<8x2x8x16xf32>
    %80 = vector.shape_cast %79 : vector<8x2x8x16xf32> to vector<128x16xf32>
    %c0_129 = arith.constant 0 : index
    %c128_130 = arith.constant 128 : index
    %81 = vector.load %arg11[%c0_129, %c128_130] : memref<128x144xf32, #tpu.memory_space<vmem>>, vector<128x16xf32>
    tpu.vector_store %arg11[%c0_129, %c128_130], %80 {strides = array<i32>} : memref<128x144xf32, #tpu.memory_space<vmem>>, vector<128x16xf32>,
    %c0_131 = arith.constant 0 : index
    %c0_132 = arith.constant 0 : index
    %82 = vector.load %arg11[%c0_131, %c0_132] : memref<128x144xf32, #tpu.memory_space<vmem>>, vector<128x144xf32>
    %c0_133 = arith.constant 0 : index
    %c0_134 = arith.constant 0 : index
    %83 = vector.load %arg6[%c0_133, %c0_134] : memref<144x16xf32, #tpu.memory_space<vmem>>, vector<144x16xf32>
    %cst_135 = arith.constant dense<0.000000e+00> : vector<128x16xf32>
    %84 = tpu.matmul %82, %83, %cst_135 {dimension_numbers = #tpu.dot_dimension_numbers<[1], [0], [0], [1], [0, 0, 1, 1], [], []>} : vector<128x144xf32>, vector<144x16xf32>, vector<128x16xf32> -> vector<128x16xf32>
    %c0_136 = arith.constant 0 : index
    %c0_137 = arith.constant 0 : index
    %85 = vector.load %arg0[%c0_136, %c0_137] : memref<128x16xf32, #tpu.memory_space<vmem>>, vector<128x16xf32>
    %86 = arith.addf %84, %85 : vector<128x16xf32>
    %87 = vector.extract_strided_slice %86 {offsets = [0, 0], sizes = [16, 16], strides = [1, 1]} : vector<128x16xf32> to vector<16x16xf32>
    %c0_138 = arith.constant 0 : index
    %c0_139 = arith.constant 0 : index
    %88 = vector.load %arg7[%c0_138, %c0_139] : memref<16x128xf32, #tpu.memory_space<vmem>>, vector<16x16xf32>
    tpu.vector_store %arg7[%c0_138, %c0_139], %87 {strides = array<i32>} : memref<16x128xf32, #tpu.memory_space<vmem>>, vector<16x16xf32>,
    %89 = vector.extract_strided_slice %86 {offsets = [16, 0], sizes = [16, 16], strides = [1, 1]} : vector<128x16xf32> to vector<16x16xf32>
    %c0_140 = arith.constant 0 : index
    %c16_141 = arith.constant 16 : index
    %90 = vector.load %arg7[%c0_140, %c16_141] : memref<16x128xf32, #tpu.memory_space<vmem>>, vector<16x16xf32>
    tpu.vector_store %arg7[%c0_140, %c16_141], %89 {strides = array<i32>} : memref<16x128xf32, #tpu.memory_space<vmem>>, vector<16x16xf32>,
    %91 = vector.extract_strided_slice %86 {offsets = [32, 0], sizes = [16, 16], strides = [1, 1]} : vector<128x16xf32> to vector<16x16xf32>
    %c0_142 = arith.constant 0 : index
    %c32_143 = arith.constant 32 : index
    %92 = vector.load %arg7[%c0_142, %c32_143] : memref<16x128xf32, #tpu.memory_space<vmem>>, vector<16x16xf32>
    tpu.vector_store %arg7[%c0_142, %c32_143], %91 {strides = array<i32>} : memref<16x128xf32, #tpu.memory_space<vmem>>, vector<16x16xf32>,
    %93 = vector.extract_strided_slice %86 {offsets = [48, 0], sizes = [16, 16], strides = [1, 1]} : vector<128x16xf32> to vector<16x16xf32>
    %c0_144 = arith.constant 0 : index
    %c48_145 = arith.constant 48 : index
    %94 = vector.load %arg7[%c0_144, %c48_145] : memref<16x128xf32, #tpu.memory_space<vmem>>, vector<16x16xf32>
    tpu.vector_store %arg7[%c0_144, %c48_145], %93 {strides = array<i32>} : memref<16x128xf32, #tpu.memory_space<vmem>>, vector<16x16xf32>,
    %95 = vector.extract_strided_slice %86 {offsets = [64, 0], sizes = [16, 16], strides = [1, 1]} : vector<128x16xf32> to vector<16x16xf32>
    %c0_146 = arith.constant 0 : index
    %c64_147 = arith.constant 64 : index
    %96 = vector.load %arg7[%c0_146, %c64_147] : memref<16x128xf32, #tpu.memory_space<vmem>>, vector<16x16xf32>
    tpu.vector_store %arg7[%c0_146, %c64_147], %95 {strides = array<i32>} : memref<16x128xf32, #tpu.memory_space<vmem>>, vector<16x16xf32>,
    %97 = vector.extract_strided_slice %86 {offsets = [80, 0], sizes = [16, 16], strides = [1, 1]} : vector<128x16xf32> to vector<16x16xf32>
    %c0_148 = arith.constant 0 : index
    %c80_149 = arith.constant 80 : index
    %98 = vector.load %arg7[%c0_148, %c80_149] : memref<16x128xf32, #tpu.memory_space<vmem>>, vector<16x16xf32>
    tpu.vector_store %arg7[%c0_148, %c80_149], %97 {strides = array<i32>} : memref<16x128xf32, #tpu.memory_space<vmem>>, vector<16x16xf32>,
    %99 = vector.extract_strided_slice %86 {offsets = [96, 0], sizes = [16, 16], strides = [1, 1]} : vector<128x16xf32> to vector<16x16xf32>
    %c0_150 = arith.constant 0 : index
    %c96_151 = arith.constant 96 : index
    %100 = vector.load %arg7[%c0_150, %c96_151] : memref<16x128xf32, #tpu.memory_space<vmem>>, vector<16x16xf32>
    tpu.vector_store %arg7[%c0_150, %c96_151], %99 {strides = array<i32>} : memref<16x128xf32, #tpu.memory_space<vmem>>, vector<16x16xf32>,
    %101 = vector.extract_strided_slice %86 {offsets = [112, 0], sizes = [16, 16], strides = [1, 1]} : vector<128x16xf32> to vector<16x16xf32>
    %c0_152 = arith.constant 0 : index
    %c112_153 = arith.constant 112 : index
    %102 = vector.load %arg7[%c0_152, %c112_153] : memref<16x128xf32, #tpu.memory_space<vmem>>, vector<16x16xf32>
    tpu.vector_store %arg7[%c0_152, %c112_153], %101 {strides = array<i32>} : memref<16x128xf32, #tpu.memory_space<vmem>>, vector<16x16xf32>,
    return
  }
}

</mosaic_0001>

<bundles_post_ra>
// kernel: basic_block_forward.1
= control target key start
LH: loop header
LB: loop body
LE: loop exit
PB: predicated region body
PF: predicated region fallthrough
CT: control target
= control target key end

     0   :  { %vm26_vm0 = vcmask 130048   ;;  %vm28_vm1 = vcmask 123904   ;;  %v2440_v0 = vmov 0.0   ;;  %v2441_v4 = vmov 0.0|0.0   ;;  %s2442_s10 = smov 48   ;;  %s2443_s15 = smov 96   ;;  %s3843_s0 = inlined_call_operand.vmem [shape: f32[128,16], index: 0, kind: input, shape index: {}]   ;;  %s3844_s1 = inlined_call_operand.vmem [shape: f32[1,16], index: 1, kind: input, shape index: {}]   ;;  %s3845_s2 = inlined_call_operand.vmem [shape: f32[1,16], index: 2, kind: input, shape index: {}]   ;;  %s3846_s3 = inlined_call_operand.vmem [shape: f32[144,16], index: 3, kind: input, shape index: {}]   ;;  %s3847_s4 = inlined_call_operand.vmem [shape: f32[1,16], index: 4, kind: input, shape index: {}]   ;;  %s3848_s5 = inlined_call_operand.vmem [shape: f32[1,16], index: 5, kind: input, shape index: {}]   ;;  %s3849_s6 = inlined_call_operand.vmem [shape: f32[144,16], index: 6, kind: input, shape index: {}]   ;;  %s3850_s7 = inlined_call_operand.vmem [shape: f32[16,128], index: 7, kind: output, shape index: {}]  }
   0x1   :  { %27 = vst.msk [vmem:[#allocation2] sm:$0xff] %vm26_vm0, %v2440_v0  ;;  %30 = vst.msk [vmem:[#allocation2 + $0x10] sm:$0xff] %vm26_vm0, %v2440_v0  ;;  %v68_v1 = vld [vmem:[%s3843_s0] sm:$0xff]  ;;  %2377 = vmatprep.subr.bf16.mxu0 %v2441_v4  ;;  %2404 = vmatprep.subr.bf16.mxu1 %v2441_v4  ;;  %v70_v6 = vld [vmem:[%s3843_s0 + $0x10] sm:$0xff]  ;;  %s2444_s20 = smov 16   ;;  %s2445_s23 = smov 64  }
   0x2   :  { %29 = vst.msk [vmem:[#allocation2 + $0x8] sm:$0x3] %vm28_vm1, %v2440_v0  ;;  %31 = vst.msk [vmem:[#allocation2 + $0x18] sm:$0x3] %vm28_vm1, %v2440_v0  ;;  %v2655_v2 = vld [vmem:[%s3844_s1] ss:$0 sm:$0xff] }
   0x3   :  { %32 = vst.msk [vmem:[#allocation2 + $0x20] sm:$0xff] %vm26_vm0, %v2440_v0  ;;  %34 = vst.msk [vmem:[#allocation2 + $0x30] sm:$0xff] %vm26_vm0, %v2440_v0  ;;  %v2660_v3 = vld [vmem:[%s3845_s2] ss:$0 sm:$0xff]  ;;  %v91_v5 = vmul.f32 %v2655_v2, %v68_v1  ;;  %v69_v7 = vld [vmem:[%s3843_s0 + $0x8] sm:$0xff]  ;;  %v93_v9 = vmul.f32 %v2655_v2, %v70_v6  ;;  %s2446_s24 = smov 32  }
   0x4   :  { %33 = vst.msk [vmem:[#allocation2 + $0x28] sm:$0x3] %vm28_vm1, %v2440_v0  ;;  %35 = vst.msk [vmem:[#allocation2 + $0x38] sm:$0x3] %vm28_vm1, %v2440_v0  ;;  %v71_v8 = vld [vmem:[%s3843_s0 + $0x18] sm:$0xff]  ;;  %v92_v10 = vmul.f32 %v2655_v2, %v69_v7  ;;  %v72_v12 = vld [vmem:[%s3843_s0 + $0x20] sm:$0xff] }
   0x5   :  { %36 = vst.msk [vmem:[#allocation2 + $0x40] sm:$0xff] %vm26_vm0, %v2440_v0  ;;  %38 = vst.msk [vmem:[#allocation2 + $0x50] sm:$0xff] %vm26_vm0, %v2440_v0  ;;  %v94_v11 = vmul.f32 %v2655_v2, %v71_v8  ;;  %v73_v13 = vld [vmem:[%s3843_s0 + $0x28] sm:$0xff]  ;;  %v74_v14 = vld [vmem:[%s3843_s0 + $0x30] sm:$0xff]  ;;  %v114_v15 = vadd.f32 %v2660_v3, %v91_v5  ;;  %v95_v16 = vmul.f32 %v2655_v2, %v72_v12  ;;  %s2447_s29 = smov 80   ;;  %s2448_s11 = smov 112  }
   0x6   :  { %37 = vst.msk [vmem:[#allocation2 + $0x48] sm:$0x3] %vm28_vm1, %v2440_v0  ;;  %39 = vst.msk [vmem:[#allocation2 + $0x58] sm:$0x3] %vm28_vm1, %v2440_v0  ;;  %v96_v17 = vmul.f32 %v2655_v2, %v73_v13  ;;  %v97_v18 = vmul.f32 %v2655_v2, %v74_v14  ;;  %v75_v19 = vld [vmem:[%s3843_s0 + $0x38] sm:$0xff]  ;;  %v116_v20 = vadd.f32 %v2660_v3, %v93_v9  ;;  %v76_v24 = vld [vmem:[%s3843_s0 + $0x40] sm:$0xff] }
   0x7   :  { %40 = vst.msk [vmem:[#allocation2 + $0x60] sm:$0xff] %vm26_vm0, %v2440_v0  ;;  %42 = vst.msk [vmem:[#allocation2 + $0x70] sm:$0xff] %vm26_vm0, %v2440_v0  ;;  %v115_v21 = vadd.f32 %v2660_v3, %v92_v10  ;;  %v117_v22 = vadd.f32 %v2660_v3, %v94_v11  ;;  %v98_v23 = vmul.f32 %v2655_v2, %v75_v19  ;;  %v130_v25 = vmax.f32 %v114_v15, 0.0  ;;  %v77_v29 = vld [vmem:[%s3843_s0 + $0x48] sm:$0xff]  ;;  %v939_v30 = vld [vmem:[%s3846_s3] sm:$0xff] }
   0x8   :  { %41 = vst.msk [vmem:[#allocation2 + $0x68] sm:$0x3] %vm28_vm1, %v2440_v0  ;;  %43 = vst.msk [vmem:[#allocation2 + $0x78] sm:$0x3] %vm28_vm1, %v2440_v0  ;;  %v118_v26 = vadd.f32 %v2660_v3, %v95_v16  ;;  %v119_v27 = vadd.f32 %v2660_v3, %v96_v17  ;;  %v120_v28 = vadd.f32 %v2660_v3, %v97_v18  ;;  %v940_v31 = vld [vmem:[%s3846_s3 + $0x8] sm:$0xff]  ;;  %v132_v32 = vmax.f32 %v116_v20, 0.0 }
   0x9   :  { %44 = vst.msk [vmem:[#allocation2 + $0x80] sm:$0xff] %vm26_vm0, %v2440_v0  ;;  %46 = vst.msk [vmem:[#allocation2 + $0x90] sm:$0xff] %vm26_vm0, %v2440_v0  ;;  %v131_v33 = vmax.f32 %v115_v21, 0.0  ;;  %v133_v34 = vmax.f32 %v117_v22, 0.0  ;;  %v121_v35 = vadd.f32 %v2660_v3, %v98_v23  ;;  %v941_v36 = vld [vmem:[%s3846_s3 + $0x10] sm:$0xff]  ;;  %v390_v38 = vld [vmem:[#allocation2 + $0x1] sm:$0xff]  ;;  %v99_v43 = vmul.f32 %v2655_v2, %v76_v24 }
   0xa   :  { %45 = vst.msk [vmem:[#allocation2 + $0x88] sm:$0x3] %vm28_vm1, %v2440_v0  ;;  %47 = vst.msk [vmem:[#allocation2 + $0x98] sm:$0x3] %vm28_vm1, %v2440_v0  ;;  %v78_v37 = vld [vmem:[%s3843_s0 + $0x50] sm:$0xff]  ;;  %v134_v40 = vmax.f32 %v118_v26, 0.0  ;;  %422 = vrot.lane.b32.xlu1 %v390_v38, %s2442_s10  ;;  %v100_v46 = vmul.f32 %v2655_v2, %v77_v29  ;;  %v2378_v47 = vpack.c.bf16 %v940_v31, %v939_v30 }
   0xb   :  { %48 = vst.msk [vmem:[#allocation2 + $0xa0] sm:$0xff] %vm26_vm0, %v2440_v0  ;;  %50 = vst.msk [vmem:[#allocation2 + $0xb0] sm:$0xff] %vm26_vm0, %v2440_v0  ;;  %v391_v39 = vld [vmem:[#allocation2 + $0x11] sm:$0xff]  ;;  %v135_v41 = vmax.f32 %v119_v27, 0.0  ;;  %v136_v42 = vmax.f32 %v120_v28, 0.0  ;;  %v137_v45 = vmax.f32 %v121_v35, 0.0  ;;  %v122_v49 = vadd.f32 %v2660_v3, %v99_v43 }
   0xc   :  { %49 = vst.msk [vmem:[#allocation2 + $0xa8] sm:$0x3] %vm28_vm1, %v2440_v0  ;;  %51 = vst.msk [vmem:[#allocation2 + $0xb8] sm:$0x3] %vm28_vm1, %v2440_v0  ;;  %v942_v44 = vld [vmem:[%s3846_s3 + $0x18] sm:$0xff]  ;;  %424 = vrot.lane.b32.xlu0 %v391_v39, %s2442_s10  ;;  %v681_v48 = vld [vmem:[#allocation2 + $0x2] sm:$0xff]  ;;  %v101_v50 = vmul.f32 %v2655_v2, %v78_v37  ;;  %v123_v52 = vadd.f32 %v2660_v3, %v100_v46  ;;  %2379 = vmatpush1.bf16.msra.mxu0 %v2378_v47 }
   0xd   :  { %52 = vst.msk [vmem:[#allocation2 + $0xc0] sm:$0xff] %vm26_vm0, %v2440_v0  ;;  %54 = vst.msk [vmem:[#allocation2 + $0xd0] sm:$0xff] %vm26_vm0, %v2440_v0  ;;  %v163_v51 = vld [vmem:[#allocation2] sm:$0xff]  ;;  %v2381_v53 = vpack.c.bf16 %v942_v44, %v941_v36  ;;  %v79_v54 = vld [vmem:[%s3843_s0 + $0x58] sm:$0xff]  ;;  %v138_v55 = vmax.f32 %v122_v49, 0.0  ;;  %2380 = vmatprep.subr.bf16.mxu0 %v2441_v4  ;;  %vm275_vm2 = vcmask 261248  }
   0xe   :  { %53 = vst.msk [vmem:[#allocation2 + $0xc8] sm:$0x3] %vm28_vm1, %v2440_v0  ;;  %55 = vst.msk [vmem:[#allocation2 + $0xd8] sm:$0x3] %vm28_vm1, %v2440_v0  ;;  %v124_v56 = vadd.f32 %v2660_v3, %v101_v50  ;;  %v943_v57 = vld [vmem:[%s3846_s3 + $0x20] sm:$0xff]  ;;  %v944_v58 = vld [vmem:[%s3846_s3 + $0x28] sm:$0xff]  ;;  %713 = vrot.lane.b32.xlu1 %v681_v48, %s2443_s15  ;;  %v102_v61 = vmul.f32 %v2655_v2, %v79_v54 }
   0xf   :  { %56 = vst.msk [vmem:[#allocation2 + $0xe0] sm:$0xff] %vm26_vm0, %v2440_v0  ;;  %58 = vst.msk [vmem:[#allocation2 + $0xf0] sm:$0xff] %vm26_vm0, %v2440_v0  ;;  %v164_v59 = vld [vmem:[#allocation2 + $0x10] sm:$0xff]  ;;  %v139_v60 = vmax.f32 %v123_v52, 0.0  ;;  %v80_v62 = vld [vmem:[%s3843_s0 + $0x60] sm:$0xff]  ;;  %v2384_v5 = vpack.c.bf16 %v944_v58, %v943_v57  ;;  %vm373_vm3 = vcmask 392448  }
  0x10   :  { %57 = vst.msk [vmem:[#allocation2 + $0xe8] sm:$0x3] %vm28_vm1, %v2440_v0  ;;  %59 = vst.msk [vmem:[#allocation2 + $0xf8] sm:$0x3] %vm28_vm1, %v2440_v0  ;;  %v140_v63 = vmax.f32 %v124_v56, 0.0  ;;  %2382 = vmatpush1.bf16.msra.mxu0 %v2381_v53  ;;  %v945_v6 = vld [vmem:[%s3846_s3 + $0x30] sm:$0xff]  ;;  %v125_v7 = vadd.f32 %v2660_v3, %v102_v61  ;;  %v103_v8 = vmul.f32 %v2655_v2, %v80_v62 }
  0x11   :  { %60 = vst.msk [vmem:[#allocation2 + $0x100] sm:$0xff] %vm26_vm0, %v2440_v0  ;;  %62 = vst.msk [vmem:[#allocation2 + $0x110] sm:$0xff] %vm26_vm0, %v2440_v0  ;;  %2383 = vmatprep.subr.bf16.mxu0 %v2441_v4  ;;  %v946_v11 = vld [vmem:[%s3846_s3 + $0x38] sm:$0xff]  ;;  %v947_v23 = vld [vmem:[%s3846_s3 + $0x40] sm:$0xff]  ;;  %vm470_vm4 = vcmask 523648   ;;  %vm567_vm5 = vcmask 654848  }
  0x12   :  { %61 = vst.msk [vmem:[#allocation2 + $0x108] sm:$0x3] %vm28_vm1, %v2440_v0  ;;  %63 = vst.msk [vmem:[#allocation2 + $0x118] sm:$0x3] %vm28_vm1, %v2440_v0  ;;  %v141_v14 = vmax.f32 %v125_v7, 0.0  ;;  %v126_v15 = vadd.f32 %v2660_v3, %v103_v8  ;;  %v2387_v20 = vpack.c.bf16 %v946_v11, %v945_v6  ;;  %v948_v24 = vld [vmem:[%s3846_s3 + $0x48] sm:$0xff] }
  0x13   :  { %64 = vst.msk [vmem:[#allocation2 + $0x120] sm:$0xff] %vm26_vm0, %v2440_v0  ;;  %66 = vst.msk [vmem:[#allocation2 + $0x130] sm:$0xff] %vm26_vm0, %v2440_v0  ;;  %v949_v35 = vld [vmem:[%s3846_s3 + $0x50] sm:$0xff]  ;;  %v950_v36 = vld [vmem:[%s3846_s3 + $0x58] sm:$0xff]  ;;  %vm664_vm6 = vcmask 786048   ;;  %vm761_vm7 = vcmask 917248  }
  0x14   :  { %65 = vst.msk [vmem:[#allocation2 + $0x128] sm:$0x3] %vm28_vm1, %v2440_v0  ;;  %67 = vst.msk [vmem:[#allocation2 + $0x138] sm:$0x3] %vm28_vm1, %v2440_v0  ;;  %2385 = vmatpush1.bf16.msra.mxu0 %v2384_v5  ;;  %v142_v21 = vmax.f32 %v126_v15, 0.0  ;;  %v81_v38 = vld [vmem:[%s3843_s0 + $0x68] sm:$0xff] }
  0x15   :  { %1212 = vst.msk [vmem:[#allocation4] sm:$0xff] %vm26_vm0, %v2440_v0  ;;  %1214 = vst.msk [vmem:[#allocation4 + $0x10] sm:$0xff] %vm26_vm0, %v2440_v0  ;;  %2386 = vmatprep.subr.bf16.mxu0 %v2441_v4  ;;  %v951_v44 = vld [vmem:[%s3846_s3 + $0x60] sm:$0xff]  ;;  %v82_v50 = vld [vmem:[%s3843_s0 + $0x70] sm:$0xff]  ;;  %vm858_vm8 = vcmask 1048448  }
  0x16   :  { %1213 = vst.msk [vmem:[#allocation4 + $0x8] sm:$0x3] %vm28_vm1, %v2440_v0  ;;  %1215 = vst.msk [vmem:[#allocation4 + $0x18] sm:$0x3] %vm28_vm1, %v2440_v0  ;;  %v105_v52 = vmul.f32 %v2655_v2, %v82_v50  ;;  %v953_v53 = vld [vmem:[%s3846_s3 + $0x70] sm:$0xff]  ;;  %v954_v54 = vld [vmem:[%s3846_s3 + $0x78] sm:$0xff] }
  0x17   :  { %1216 = vst.msk [vmem:[#allocation4 + $0x20] sm:$0xff] %vm26_vm0, %v2440_v0  ;;  %1218 = vst.msk [vmem:[#allocation4 + $0x30] sm:$0xff] %vm26_vm0, %v2440_v0  ;;  %v2399_v57 = vpack.c.bf16 %v954_v54, %v953_v53  ;;  %v682_v62 = vld [vmem:[#allocation2 + $0x12] sm:$0xff] }
  0x18   :  { %1217 = vst.msk [vmem:[#allocation4 + $0x28] sm:$0x3] %vm28_vm1, %v2440_v0  ;;  %1219 = vst.msk [vmem:[#allocation4 + $0x38] sm:$0x3] %vm28_vm1, %v2440_v0  ;;  %2388 = vmatpush1.bf16.msra.mxu0 %v2387_v20  ;;  %v128_v56 = vadd.f32 %v2660_v3, %v105_v52  ;;  %v83_v6 = vld [vmem:[%s3843_s0 + $0x78] sm:$0xff] }
  0x19   :  { %1220 = vst.msk [vmem:[#allocation4 + $0x40] sm:$0xff] %vm26_vm0, %v2440_v0  ;;  %1222 = vst.msk [vmem:[#allocation4 + $0x50] sm:$0xff] %vm26_vm0, %v2440_v0  ;;  %2389 = vmatprep.subr.bf16.mxu0 %v2441_v4  ;;  %v106_v7 = vmul.f32 %v2655_v2, %v83_v6 }
  0x1a   :  { %1221 = vst.msk [vmem:[#allocation4 + $0x48] sm:$0x3] %vm28_vm1, %v2440_v0  ;;  %1223 = vst.msk [vmem:[#allocation4 + $0x58] sm:$0x3] %vm28_vm1, %v2440_v0  ;;  %v144_v58 = vmax.f32 %v128_v56, 0.0 }
  0x1b   :  { %1224 = vst.msk [vmem:[#allocation4 + $0x60] sm:$0xff] %vm26_vm0, %v2440_v0  ;;  %1226 = vst.msk [vmem:[#allocation4 + $0x70] sm:$0xff] %vm26_vm0, %v2440_v0  ;;  %v129_v8 = vadd.f32 %v2660_v3, %v106_v7 }
  0x1c   :  { %1225 = vst.msk [vmem:[#allocation4 + $0x68] sm:$0x3] %vm28_vm1, %v2440_v0  ;;  %1227 = vst.msk [vmem:[#allocation4 + $0x78] sm:$0x3] %vm28_vm1, %v2440_v0 }
  0x1d   :  { %1228 = vst.msk [vmem:[#allocation4 + $0x80] sm:$0xff] %vm26_vm0, %v2440_v0  ;;  %1230 = vst.msk [vmem:[#allocation4 + $0x90] sm:$0xff] %vm26_vm0, %v2440_v0 }
  0x1e   :  { %1229 = vst.msk [vmem:[#allocation4 + $0x88] sm:$0x3] %vm28_vm1, %v2440_v0  ;;  %1231 = vst.msk [vmem:[#allocation4 + $0x98] sm:$0x3] %vm28_vm1, %v2440_v0 }
  0x1f   :  { %1232 = vst.msk [vmem:[#allocation4 + $0xa0] sm:$0xff] %vm26_vm0, %v2440_v0  ;;  %1234 = vst.msk [vmem:[#allocation4 + $0xb0] sm:$0xff] %vm26_vm0, %v2440_v0 }
  0x20   :  { %1233 = vst.msk [vmem:[#allocation4 + $0xa8] sm:$0x3] %vm28_vm1, %v2440_v0  ;;  %1235 = vst.msk [vmem:[#allocation4 + $0xb8] sm:$0x3] %vm28_vm1, %v2440_v0 }
  0x21   :  { %1236 = vst.msk [vmem:[#allocation4 + $0xc0] sm:$0xff] %vm26_vm0, %v2440_v0  ;;  %1238 = vst.msk [vmem:[#allocation4 + $0xd0] sm:$0xff] %vm26_vm0, %v2440_v0 }
  0x22   :  { %1237 = vst.msk [vmem:[#allocation4 + $0xc8] sm:$0x3] %vm28_vm1, %v2440_v0  ;;  %1239 = vst.msk [vmem:[#allocation4 + $0xd8] sm:$0x3] %vm28_vm1, %v2440_v0 }
  0x23   :  { %1240 = vst.msk [vmem:[#allocation4 + $0xe0] sm:$0xff] %vm26_vm0, %v2440_v0  ;;  %1242 = vst.msk [vmem:[#allocation4 + $0xf0] sm:$0xff] %vm26_vm0, %v2440_v0 }
  0x24   :  { %1241 = vst.msk [vmem:[#allocation4 + $0xe8] sm:$0x3] %vm28_vm1, %v2440_v0  ;;  %1243 = vst.msk [vmem:[#allocation4 + $0xf8] sm:$0x3] %vm28_vm1, %v2440_v0 }
  0x25   :  { %1244 = vst.msk [vmem:[#allocation4 + $0x100] sm:$0xff] %vm26_vm0, %v2440_v0  ;;  %1246 = vst.msk [vmem:[#allocation4 + $0x110] sm:$0xff] %vm26_vm0, %v2440_v0 }
  0x26   :  { %1245 = vst.msk [vmem:[#allocation4 + $0x108] sm:$0x3] %vm28_vm1, %v2440_v0  ;;  %1247 = vst.msk [vmem:[#allocation4 + $0x118] sm:$0x3] %vm28_vm1, %v2440_v0 }
  0x27   :  { %1248 = vst.msk [vmem:[#allocation4 + $0x120] sm:$0xff] %vm26_vm0, %v2440_v0  ;;  %1250 = vst.msk [vmem:[#allocation4 + $0x130] sm:$0xff] %vm26_vm0, %v2440_v0 }
  0x28   :  { %1249 = vst.msk [vmem:[#allocation4 + $0x128] sm:$0x3] %vm28_vm1, %v2440_v0  ;;  %1251 = vst.msk [vmem:[#allocation4 + $0x138] sm:$0x3] %vm28_vm1, %v2440_v0 }
  0x29   :  { %147 = vst.msk [vmem:[#allocation2 + $0x21] sm:$0xff] %vm26_vm0, %v130_v25  ;;  %149 = vst.msk [vmem:[#allocation2 + $0x41] sm:$0xff] %vm26_vm0, %v132_v32 }
  0x2a   :  { %148 = vst.msk [vmem:[#allocation2 + $0x31] sm:$0xff] %vm26_vm0, %v131_v33  ;;  %150 = vst.msk [vmem:[#allocation2 + $0x51] sm:$0xff] %vm26_vm0, %v133_v34  ;;  %v2390_v33 = vpack.c.bf16 %v948_v24, %v947_v23 }
  0x2b   :  { %151 = vst.msk [vmem:[#allocation2 + $0x61] sm:$0xff] %vm26_vm0, %v134_v40  ;;  %152 = vst.msk [vmem:[#allocation2 + $0x71] sm:$0xff] %vm26_vm0, %v135_v41  ;;  %v104_v40 = vmul.f32 %v2655_v2, %v81_v38  ;;  %v2393_v41 = vpack.c.bf16 %v950_v36, %v949_v35 }
  0x2c   :  { %153 = vst.msk [vmem:[#allocation2 + $0x81] sm:$0xff] %vm26_vm0, %v136_v42  ;;  %154 = vst.msk [vmem:[#allocation2 + $0x91] sm:$0xff] %vm26_vm0, %v137_v45  ;;  %2391 = vmatpush1.bf16.msra.mxu0 %v2390_v33  ;;  %v952_v45 = vld [vmem:[%s3846_s3 + $0x68] sm:$0xff] }
  0x2d   :  { %179 = vst.msk [vmem:[#allocation3] sm:$0xff] %vm26_vm0, %v163_v51  ;;  %180 = vst.msk [vmem:[#allocation3 + $0x10] sm:$0xff] %vm26_vm0, %v164_v59  ;;  %2392 = vmatprep.subr.bf16.mxu0 %v2441_v4  ;;  %v127_v47 = vadd.f32 %v2660_v3, %v104_v40  ;;  %v2396_v51 = vpack.c.bf16 %v952_v45, %v951_v44  ;;  %v955_v59 = vld [vmem:[%s3846_s3 + $0x80] sm:$0xff] }
  0x2e   :  { %155 = vst.msk [vmem:[#allocation2 + $0xa1] sm:$0xff] %vm26_vm0, %v138_v55  ;;  %156 = vst.msk [vmem:[#allocation2 + $0xb1] sm:$0xff] %vm26_vm0, %v139_v60  ;;  %v956_v60 = vld [vmem:[%s3846_s3 + $0x88] sm:$0xff] }
  0x2f   :  { %157 = vst.msk [vmem:[#allocation2 + $0xc1] sm:$0xff] %vm26_vm0, %v140_v63  ;;  %158 = vst.msk [vmem:[#allocation2 + $0xd1] sm:$0xff] %vm26_vm0, %v141_v14  ;;  %v143_v49 = vmax.f32 %v127_v47, 0.0  ;;  %v2402_v63 = vpack.c.bf16 %v956_v60, %v955_v59 }
  0x30   :  { %v195_v0 = vld [vmem:[#allocation2 + $0x20] sm:$0xff]  ;;  %159 = vst.msk [vmem:[#allocation2 + $0xe1] sm:$0xff] %vm26_vm0, %v142_v21  ;;  %2394 = vmatpush1.bf16.msra.mxu0 %v2393_v41  ;;  %161 = vst.msk [vmem:[#allocation2 + $0x101] sm:$0xff] %vm26_vm0, %v144_v58 }
  0x31   :  { %v2756_v1 = vld [vmem:[#allocation2 + $0x21] sm:$0xff]  ;;  %227 = vrot.lane.b32.xlu0 %v195_v0, %s2444_s20  ;;  %v196_v10 = vld [vmem:[#allocation2 + $0x30] sm:$0xff]  ;;  %181 = vst.msk [vmem:[#allocation3 + $0x20] sm:$0xff] %vm26_vm0, %v195_v0  ;;  %2395 = vmatprep.subr.bf16.mxu0 %v2441_v4  ;;  %160 = vst.msk [vmem:[#allocation2 + $0xf1] sm:$0xff] %vm26_vm0, %v143_v49 }
  0x32   :  { %v2765_v9 = vld [vmem:[#allocation2 + $0x40] sm:$0xff]  ;;  %519 = vrot.lane.b32.xlu1 %v2756_v1, %s2445_s23  ;;  %v2775_v12 = vld [vmem:[#allocation2 + $0x50] sm:$0xff]  ;;  %182 = vst.msk [vmem:[#allocation3 + $0x30] sm:$0xff] %vm26_vm0, %v196_v10 }
  0x33   :  { %v2777_v13 = vld [vmem:[#allocation2 + $0x60] sm:$0xff]  ;;  %183 = vst.msk [vmem:[#allocation3 + $0x40] sm:$0xff] %vm26_vm0, %v2765_v9  ;;  %184 = vst.msk [vmem:[#allocation3 + $0x50] sm:$0xff] %vm26_vm0, %v2775_v12  ;;  %v2789_v17 = vld [vmem:[#allocation2 + $0x70] sm:$0xff] }
  0x34   :  { %v2783_v16 = vld [vmem:[#allocation2 + $0x41] sm:$0xff]  ;;  %185 = vst.msk [vmem:[#allocation3 + $0x60] sm:$0xff] %vm26_vm0, %v2777_v13  ;;  %v2798_v22 = vld [vmem:[#allocation2 + $0x52] sm:$0xff]  ;;  %186 = vst.msk [vmem:[#allocation3 + $0x70] sm:$0xff] %vm26_vm0, %v2789_v17  ;;  %2397 = vmatpush1.bf16.msra.mxu0 %v2396_v51 }
  0x35   :  { %v2791_v18 = vld [vmem:[#allocation2 + $0x42] sm:$0xff]  ;;  %325 = vrot.lane.b32.xlu0 %v2765_v9, %s2446_s24  ;;  %v2815_v25 = vld [vmem:[#allocation2 + $0x90] sm:$0xff]  ;;  %892 = vst.msk [vmem:[#allocation3 + $0x18] sm:$0xff] %vm26_vm0, %v2798_v22  ;;  %2398 = vmatprep.subr.bf16.mxu0 %v2441_v4 }
  0x36   :  { %v2793_v19 = vld [vmem:[#allocation2 + $0x80] sm:$0xff]  ;;  %891 = vst.msk [vmem:[#allocation3 + $0x8] sm:$0xff] %vm26_vm0, %v2791_v18  ;;  %616 = vrot.lane.b32.xlu1 %v2783_v16, %s2447_s29  ;;  %v2826_v29 = vld [vmem:[#allocation2 + $0x72] sm:$0xff]  ;;  %188 = vst.msk [vmem:[#allocation3 + $0x90] sm:$0xff] %vm26_vm0, %v2815_v25 }
  0x37   :  { %187 = vst.msk [vmem:[#allocation3 + $0x80] sm:$0xff] %vm26_vm0, %v2793_v19  ;;  %v2817_v26 = vld [vmem:[#allocation2 + $0x62] sm:$0xff]  ;;  %v2834_v30 = vld [vmem:[#allocation2 + $0xb0] sm:$0xff]  ;;  %894 = vst.msk [vmem:[#allocation3 + $0x38] sm:$0xff] %vm26_vm0, %v2826_v29 }
  0x38   :  { %v2819_v27 = vld [vmem:[#allocation2 + $0xa0] sm:$0xff]  ;;  %893 = vst.msk [vmem:[#allocation3 + $0x28] sm:$0xff] %vm26_vm0, %v2817_v26  ;;  %v2844_v34 = vld [vmem:[#allocation2 + $0x92] sm:$0xff]  ;;  %190 = vst.msk [vmem:[#allocation3 + $0xb0] sm:$0xff] %vm26_vm0, %v2834_v30  ;;  %2400 = vmatpush1.bf16.msra.mxu0 %v2399_v57 }
  0x39   :  { %v2824_v28 = vld [vmem:[#allocation2 + $0x22] sm:$0xff]  ;;  %189 = vst.msk [vmem:[#allocation3 + $0xa0] sm:$0xff] %vm26_vm0, %v2819_v27  ;;  %229 = vrot.lane.b32.xlu0 %v196_v10, %s2444_s20  ;;  %896 = vst.msk [vmem:[#allocation3 + $0x58] sm:$0xff] %vm26_vm0, %v2844_v34  ;;  %v2867_v39 = vld [vmem:[#allocation2 + $0xd0] sm:$0xff]  ;;  %2401 = vmatprep.subr.bf16.mxu0 %v2441_v4 }
  0x3a   :  { %v2836_v31 = vld [vmem:[#allocation2 + $0x82] sm:$0xff]  ;;  %810 = vrot.lane.b32.xlu1 %v2824_v28, %s2448_s11  ;;  %v2872_v43 = vld [vmem:[#allocation2 + $0xb2] sm:$0xff]  ;;  %192 = vst.msk [vmem:[#allocation3 + $0xd0] sm:$0xff] %vm26_vm0, %v2867_v39 }
  0x3b   :  { %v2838_v32 = vld [vmem:[#allocation2 + $0xc0] sm:$0xff]  ;;  %895 = vst.msk [vmem:[#allocation3 + $0x48] sm:$0xff] %vm26_vm0, %v2836_v31  ;;  %898 = vst.msk [vmem:[#allocation3 + $0x78] sm:$0xff] %vm26_vm0, %v2872_v43  ;;  %v488_v48 = vld [vmem:[#allocation2 + $0x31] sm:$0xff] }
  0x3c   :  { %191 = vst.msk [vmem:[#allocation3 + $0xc0] sm:$0xff] %vm26_vm0, %v2838_v32  ;;  %v2860_v37 = vld [vmem:[#allocation2 + $0xa2] sm:$0xff]  ;;  %v585_v55 = vld [vmem:[#allocation2 + $0x51] sm:$0xff]  ;;  %2403 = vmatpush1.bf16.msra.mxu0 %v2402_v63 }
  0x3d   :  { %897 = vst.msk [vmem:[#allocation3 + $0x68] sm:$0xff] %vm26_vm0, %v2860_v37  ;;  %v908_v42 = vld [vmem:[#allocation3 + $0x8] sm:$0xff]  ;;  %327 = vrot.lane.b32.xlu0 %v2775_v12, %s2446_s24  ;;  %v2885_v46 = vld [vmem:[#allocation2 + $0xe0] sm:$0xff]  ;;  %v2926_v0 = vld [vmem:[#allocation2 + $0xf0] sm:$0xff] }
  0x3e   :  { %231 = vrot.lane.b32.xlu1 %v2765_v9, %s2444_s20  ;;  %2343 = vmatprep.mubr.msk.f32.mxu0 %vm26_vm0, %v908_v42  ;;  %193 = vst.msk [vmem:[#allocation3 + $0xe0] sm:$0xff] %vm26_vm0, %v2885_v46  ;;  %v2919_v61 = vld [vmem:[#allocation2 + $0xc2] sm:$0xff]  ;;  %194 = vst.msk [vmem:[#allocation3 + $0xf0] sm:$0xff] %vm26_vm0, %v2926_v0  ;;  %v145_v9 = vmax.f32 %v129_v8, 0.0  ;;  %v2949_v10 = vld [vmem:[#allocation2 + $0xd2] sm:$0xff] }
  0x3f   :  { %899 = vst.msk [vmem:[#allocation3 + $0x88] sm:$0xff] %vm26_vm0, %v2919_v61  ;;  %v586_v5 = vld [vmem:[#allocation2 + $0x61] sm:$0xff]  ;;  %900 = vst.msk [vmem:[#allocation3 + $0x98] sm:$0xff] %vm26_vm0, %v2949_v10  ;;  %v587_v2 = vld [vmem:[#allocation2 + $0x71] sm:$0xff] }
  0x40   :  { %162 = vst.msk [vmem:[#allocation2 + $0x111] sm:$0xff] %vm26_vm0, %v145_v9  ;;  %v2961_v3 = vld [vmem:[#allocation2 + $0xe2] sm:$0xff]  ;;  %v910_v33 = vld [vmem:[#allocation3 + $0x18] sm:$0xff] }
  0x41   :  { %521 = vrot.lane.b32.xlu0 %v488_v48, %s2445_s23  ;;  %901 = vst.msk [vmem:[#allocation3 + $0xa8] sm:$0xff] %vm26_vm0, %v2961_v3  ;;  %v588_v11 = vld [vmem:[#allocation2 + $0x81] sm:$0xff]  ;;  %v3111_v53 = vld [vmem:[#allocation2 + $0xf1] sm:$0xff] }
  0x42   :  { %329 = vrot.lane.b32.xlu1 %v2777_v13, %s2446_s24  ;;  %v2991_v14 = vld [vmem:[#allocation2 + $0x102] sm:$0xff] }
  0x43   :  { %903 = vst.msk [vmem:[#allocation3 + $0xc8] sm:$0xff] %vm26_vm0, %v2991_v14  ;;  %v2999_v15 = vld [vmem:[#allocation2 + $0xa1] sm:$0xff] }
  0x44   :  { %v3032_v20 = vld [vmem:[#allocation2 + $0xc1] sm:$0xff] }
  0x45   :  { %618 = vrot.lane.b32.xlu0 %v585_v55, %s2447_s29  ;;  %v3079_v41 = vld [vmem:[#allocation2 + $0xe1] sm:$0xff] }
  0x46   :  { %426 = vrot.lane.b32.xlu1 %v2756_v1, %s2442_s10  ;;  %v779_v1 = vld [vmem:[#allocation2 + $0x32] sm:$0xff]  ;;  %v305_v51 = vld [vmem:[#allocation2 + $0x100] sm:$0xff]  ;;  %v916_v7 = vld [vmem:[#allocation3 + $0x48] sm:$0xff] }
  0x47   :  { %v596_v60 = vld [vmem:[#allocation2 + $0x101] sm:$0xff] }
  0x49   :  { %715 = vrot.lane.b32.xlu0 %v682_v62, %s2443_s15 }
  0x4a   :  { %523 = vrot.lane.b32.xlu1 %v2783_v16, %s2445_s23 }
  0x4d   :  { %812 = vrot.lane.b32.xlu0 %v779_v1, %s2448_s11 }
  0x4e   :  { %620 = vrot.lane.b32.xlu1 %v586_v5, %s2447_s29 }
  0x51   :  { %233 = vrot.lane.b32.xlu0 %v2775_v12, %s2444_s20  ;;  %v2980_v12 = vld [vmem:[#allocation2 + $0xf2] sm:$0xff] }
  0x52   :  { %717 = vrot.lane.b32.xlu1 %v2824_v28, %s2443_s15  ;;  %902 = vst.msk [vmem:[#allocation3 + $0xb8] sm:$0xff] %vm26_vm0, %v2980_v12 }
  0x55   :  { %331 = vrot.lane.b32.xlu0 %v2789_v17, %s2446_s24 }
  0x56   :  { %814 = vrot.lane.b32.xlu1 %v2791_v18, %s2448_s11 }
  0x59   :  { %428 = vrot.lane.b32.xlu0 %v488_v48, %s2442_s10  ;;  %v912_v48 = vld [vmem:[#allocation3 + $0x28] sm:$0xff] }
  0x5a   :  { %235 = vrot.lane.b32.xlu1 %v2777_v13, %s2444_s20  ;;  %v589_v13 = vld [vmem:[#allocation2 + $0x91] sm:$0xff] }
  0x5d   :  { %525 = vrot.lane.b32.xlu0 %v585_v55, %s2445_s23 }
  0x5e   :  { %333 = vrot.lane.b32.xlu1 %v2793_v19, %s2446_s24 }
  0x61   :  { %622 = vrot.lane.b32.xlu0 %v587_v2, %s2447_s29 }
  0x62   :  { %430 = vrot.lane.b32.xlu1 %v2783_v16, %s2442_s10  ;;  %v3007_v16 = vld [vmem:[#allocation2 + $0x112] sm:$0xff] }
  0x63   :  { %904 = vst.msk [vmem:[#allocation3 + $0xd8] sm:$0xff] %vm26_vm0, %v3007_v16 }
  0x65   :  { %719 = vrot.lane.b32.xlu0 %v779_v1, %s2443_s15 }
  0x66   :  { %527 = vrot.lane.b32.xlu1 %v586_v5, %s2445_s23 }
  0x69   :  { %816 = vrot.lane.b32.xlu0 %v2798_v22, %s2448_s11 }
  0x6a   :  { %624 = vrot.lane.b32.xlu1 %v588_v11, %s2447_s29 }
  0x6d   :  { %237 = vrot.lane.b32.xlu0 %v2789_v17, %s2444_s20  ;;  %v3023_v17 = vld [vmem:[#allocation2 + $0xb1] sm:$0xff] }
  0x6e   :  { %721 = vrot.lane.b32.xlu1 %v2791_v18, %s2443_s15 }
  0x71   :  { %335 = vrot.lane.b32.xlu0 %v2815_v25, %s2446_s24 }
  0x72   :  { %818 = vrot.lane.b32.xlu1 %v2817_v26, %s2448_s11 }
  0x75   :  { %432 = vrot.lane.b32.xlu0 %v585_v55, %s2442_s10  ;;  %v914_v55 = vld [vmem:[#allocation3 + $0x38] sm:$0xff] }
  0x76   :  { %239 = vrot.lane.b32.xlu1 %v2793_v19, %s2444_s20 }
  0x79   :  { %529 = vrot.lane.b32.xlu0 %v587_v2, %s2445_s23 }
  0x7a   :  { %337 = vrot.lane.b32.xlu1 %v2819_v27, %s2446_s24 }
  0x7c   :  { %v423_v18 = vpop.permute.xlu1 %422 }
  0x7d   :  { %626 = vrot.lane.b32.xlu0 %v589_v13, %s2447_s29 }
  0x7e   :  { %434 = vrot.lane.b32.xlu1 %v586_v5, %s2442_s10  ;;  %v425_v19 = vpop.permute.xlu0 %424 }
  0x80   :  { %v714_v21 = vpop.permute.xlu1 %713 }
  0x81   :  { %723 = vrot.lane.b32.xlu0 %v2798_v22, %s2443_s15 }
  0x82   :  { %531 = vrot.lane.b32.xlu1 %v588_v11, %s2445_s23 }
  0x85   :  { %820 = vrot.lane.b32.xlu0 %v2826_v29, %s2448_s11 }
  0x86   :  { %628 = vrot.lane.b32.xlu1 %v2999_v15, %s2447_s29 }
  0x89   :  { %241 = vrot.lane.b32.xlu0 %v2815_v25, %s2444_s20 }
  0x8a   :  { %725 = vrot.lane.b32.xlu1 %v2817_v26, %s2443_s15 }
  0x8d   :  { %339 = vrot.lane.b32.xlu0 %v2834_v30, %s2446_s24 }
  0x8e   :  { %822 = vrot.lane.b32.xlu1 %v2836_v31, %s2448_s11 }
  0x91   :  { %436 = vrot.lane.b32.xlu0 %v587_v2, %s2442_s10  ;;  %v307_v2 = vld [vmem:[#allocation2 + $0x120] sm:$0xff] }
  0x92   :  { %243 = vrot.lane.b32.xlu1 %v2819_v27, %s2444_s20 }
  0x95   :  { %533 = vrot.lane.b32.xlu0 %v589_v13, %s2445_s23 }
  0x96   :  { %341 = vrot.lane.b32.xlu1 %v2838_v32, %s2446_s24 }
  0x99   :  { %630 = vrot.lane.b32.xlu0 %v3023_v17, %s2447_s29 }
  0x9a   :  { %438 = vrot.lane.b32.xlu1 %v588_v11, %s2442_s10 }
  0x9d   :  { %727 = vrot.lane.b32.xlu0 %v2826_v29, %s2443_s15 }
  0x9e   :  { %535 = vrot.lane.b32.xlu1 %v2999_v15, %s2445_s23 }
  0xa1   :  { %824 = vrot.lane.b32.xlu0 %v2844_v34, %s2448_s11 }
  0xa2   :  { %632 = vrot.lane.b32.xlu1 %v3032_v20, %s2447_s29 }
  0xa3   :  { %v228_v22 = vpop.permute.xlu0 %227 }
  0xa4   :  { %276 = vst.msk [vmem:[#allocation3] sm:$0xff] %vm275_vm2, %v228_v22  ;;  %v520_v23 = vpop.permute.xlu1 %519 }
  0xa5   :  { %245 = vrot.lane.b32.xlu0 %v2834_v30, %s2444_s20  ;;  %v3064_v30 = vld [vmem:[#allocation2 + $0xd1] sm:$0xff] }
  0xa6   :  { %729 = vrot.lane.b32.xlu1 %v2836_v31, %s2443_s15 }
  0xa7   :  { %v326_v24 = vpop.permute.xlu0 %325 }
  0xa8   :  { %374 = vst.msk [vmem:[#allocation3] sm:$0xff] %vm373_vm3, %v326_v24  ;;  %v617_v25 = vpop.permute.xlu1 %616  ;;  %v598_v24 = vld [vmem:[#allocation2 + $0x121] sm:$0xff] }
  0xa9   :  { %471 = vst.msk [vmem:[#allocation3] sm:$0xff] %vm470_vm4, %v423_v18  ;;  %343 = vrot.lane.b32.xlu0 %v2867_v39, %s2446_s24 }
  0xaa   :  { %568 = vst.msk [vmem:[#allocation3] sm:$0xff] %vm567_vm5, %v520_v23  ;;  %826 = vrot.lane.b32.xlu1 %v2860_v37, %s2448_s11 }
  0xab   :  { %665 = vst.msk [vmem:[#allocation3] sm:$0xff] %vm664_vm6, %v617_v25  ;;  %v230_v26 = vpop.permute.xlu0 %229 }
  0xac   :  { %277 = vst.msk [vmem:[#allocation3 + $0x10] sm:$0xff] %vm275_vm2, %v230_v26  ;;  %v811_v27 = vpop.permute.xlu1 %810 }
  0xad   :  { %762 = vst.msk [vmem:[#allocation3] sm:$0xff] %vm761_vm7, %v714_v21  ;;  %440 = vrot.lane.b32.xlu0 %v589_v13, %s2442_s10  ;;  %v597_v13 = vld [vmem:[#allocation2 + $0x111] sm:$0xff]  ;;  %v889_v21 = vld [vmem:[#allocation2 + $0x122] sm:$0xff] }
  0xae   :  { %859 = vst.msk [vmem:[#allocation3] sm:$0xff] %vm858_vm8, %v811_v27  ;;  %247 = vrot.lane.b32.xlu1 %v2838_v32, %s2444_s20 }
  0xaf   :  { %v328_v28 = vpop.permute.xlu0 %327  ;;  %905 = vst.msk [vmem:[#allocation3 + $0xe8] sm:$0xff] %vm26_vm0, %v889_v21 }
  0xb0   :  { %375 = vst.msk [vmem:[#allocation3 + $0x10] sm:$0xff] %vm373_vm3, %v328_v28  ;;  %v232_v29 = vpop.permute.xlu1 %231 }
  0xb1   :  { %472 = vst.msk [vmem:[#allocation3 + $0x10] sm:$0xff] %vm470_vm4, %v425_v19  ;;  %537 = vrot.lane.b32.xlu0 %v3023_v17, %s2445_s23 }
  0xb2   :  { %278 = vst.msk [vmem:[#allocation3 + $0x20] sm:$0xff] %vm275_vm2, %v232_v29  ;;  %345 = vrot.lane.b32.xlu1 %v2885_v46, %s2446_s24  ;;  %v890_v29 = vld [vmem:[#allocation2 + $0x132] sm:$0xff] }
  0xb3   :  { %v522_v31 = vpop.permute.xlu0 %521  ;;  %906 = vst.msk [vmem:[#allocation3 + $0xf8] sm:$0xff] %vm26_vm0, %v890_v29 }
  0xb4   :  { %569 = vst.msk [vmem:[#allocation3 + $0x10] sm:$0xff] %vm567_vm5, %v522_v31  ;;  %v330_v32 = vpop.permute.xlu1 %329  ;;  %v920_v31 = vld [vmem:[#allocation3 + $0x68] sm:$0xff] }
  0xb5   :  { %v907_v35 = vld [vmem:[#allocation3] sm:$0xff]  ;;  %376 = vst.msk [vmem:[#allocation3 + $0x20] sm:$0xff] %vm373_vm3, %v330_v32  ;;  %634 = vrot.lane.b32.xlu0 %v3064_v30, %s2447_s29 }
  0xb6   :  { %1070 = vmatmul.mubr.f32.vlgmr.msra.gmra.mrb[0].mxu0 %v907_v35  ;;  %442 = vrot.lane.b32.xlu1 %v2999_v15, %s2442_s10  ;;  %v599_v35 = vld [vmem:[#allocation2 + $0x131] sm:$0xff] }
  0xb7   :  { %2344 = vmatprep.mubr.msk.f32.mxu0 %vm26_vm0, %v910_v33  ;;  %v619_v36 = vpop.permute.xlu0 %618 }
  0xb8   :  { %666 = vst.msk [vmem:[#allocation3 + $0x10] sm:$0xff] %vm664_vm6, %v619_v36  ;;  %v427_v38 = vpop.permute.xlu1 %426 }
  0xb9   :  { %473 = vst.msk [vmem:[#allocation3 + $0x20] sm:$0xff] %vm470_vm4, %v427_v38  ;;  %731 = vrot.lane.b32.xlu0 %v2844_v34, %s2443_s15 }
  0xba   :  { %539 = vrot.lane.b32.xlu1 %v3032_v20, %s2445_s23 }
  0xbb   :  { %v716_v40 = vpop.permute.xlu0 %715 }
  0xbc   :  { %763 = vst.msk [vmem:[#allocation3 + $0x10] sm:$0xff] %vm761_vm7, %v716_v40  ;;  %v524_v42 = vpop.permute.xlu1 %523  ;;  %v922_v40 = vld [vmem:[#allocation3 + $0x78] sm:$0xff] }
  0xbd   :  { %570 = vst.msk [vmem:[#allocation3 + $0x20] sm:$0xff] %vm567_vm5, %v524_v42  ;;  %828 = vrot.lane.b32.xlu0 %v2872_v43, %s2448_s11 }
  0xbe   :  { %636 = vrot.lane.b32.xlu1 %v3079_v41, %s2447_s29 }
  0xbf   :  { %v813_v44 = vpop.permute.xlu0 %812 }
  0xc0   :  { %860 = vst.msk [vmem:[#allocation3 + $0x10] sm:$0xff] %vm858_vm8, %v813_v44  ;;  %v621_v34 = vpop.permute.xlu1 %620 }
  0xc1   :  { %667 = vst.msk [vmem:[#allocation3 + $0x20] sm:$0xff] %vm664_vm6, %v621_v34  ;;  %249 = vrot.lane.b32.xlu0 %v2867_v39, %s2444_s20 }
  0xc2   :  { %733 = vrot.lane.b32.xlu1 %v2860_v37, %s2443_s15 }
  0xc3   :  { %v234_v45 = vpop.permute.xlu0 %233 }
  0xc4   :  { %279 = vst.msk [vmem:[#allocation3 + $0x30] sm:$0xff] %vm275_vm2, %v234_v45  ;;  %v718_v47 = vpop.permute.xlu1 %717  ;;  %v1494_v45 = vld [vmem:[#allocation4 + $0x1] sm:$0xff] }
  0xc5   :  { %764 = vst.msk [vmem:[#allocation3 + $0x20] sm:$0xff] %vm761_vm7, %v718_v47  ;;  %347 = vrot.lane.b32.xlu0 %v2926_v0, %s2446_s24 }
  0xc6   :  { %830 = vrot.lane.b32.xlu1 %v2919_v61, %s2448_s11 }
  0xc7   :  { %v332_v49 = vpop.permute.xlu0 %331  ;;  %v909_v50 = vld [vmem:[#allocation3 + $0x10] sm:$0xff] }
  0xc8   :  { %377 = vst.msk [vmem:[#allocation3 + $0x30] sm:$0xff] %vm373_vm3, %v332_v49  ;;  %v815_v39 = vpop.permute.xlu1 %814  ;;  %1075 = vmatmul.mubr.f32.gmra.mrb[2].mxu0 %v909_v50  ;;  %v1495_v49 = vld [vmem:[#allocation4 + $0x11] sm:$0xff] }
  0xc9   :  { %861 = vst.msk [vmem:[#allocation3 + $0x20] sm:$0xff] %vm858_vm8, %v815_v39  ;;  %444 = vrot.lane.b32.xlu0 %v3023_v17, %s2442_s10  ;;  %2345 = vmatprep.mubr.msk.f32.mxu0 %vm26_vm0, %v912_v48  ;;  %v918_v17 = vld [vmem:[#allocation3 + $0x58] sm:$0xff] }
  0xca   :  { %251 = vrot.lane.b32.xlu1 %v2885_v46, %s2444_s20 }
  0xcb   :  { %v429_v37 = vpop.permute.xlu0 %428 }
  0xcc   :  { %474 = vst.msk [vmem:[#allocation3 + $0x30] sm:$0xff] %vm470_vm4, %v429_v37  ;;  %v236_v52 = vpop.permute.xlu1 %235  ;;  %v1783_v37 = vld [vmem:[#allocation4 + $0x12] sm:$0xff] }
  0xcd   :  { %280 = vst.msk [vmem:[#allocation3 + $0x40] sm:$0xff] %vm275_vm2, %v236_v52  ;;  %541 = vrot.lane.b32.xlu0 %v3064_v30, %s2445_s23 }
  0xce   :  { %349 = vrot.lane.b32.xlu1 %v305_v51, %s2446_s24 }
  0xcf   :  { %v526_v54 = vpop.permute.xlu0 %525 }
  0xd0   :  { %571 = vst.msk [vmem:[#allocation3 + $0x30] sm:$0xff] %vm567_vm5, %v526_v54  ;;  %v334_v56 = vpop.permute.xlu1 %333  ;;  %v911_v46 = vld [vmem:[#allocation3 + $0x20] sm:$0xff] }
  0xd1   :  { %378 = vst.msk [vmem:[#allocation3 + $0x40] sm:$0xff] %vm373_vm3, %v334_v56  ;;  %638 = vrot.lane.b32.xlu0 %v3111_v53, %s2447_s29  ;;  %1080 = vmatmul.mubr.f32.gmra.mrb[4].mxu0 %v911_v46 }
  0xd2   :  { %446 = vrot.lane.b32.xlu1 %v3032_v20, %s2442_s10  ;;  %2346 = vmatprep.mubr.msk.f32.mxu0 %vm26_vm0, %v914_v55 }
  0xd3   :  { %v623_v57 = vpop.permute.xlu0 %622 }
  0xd4   :  { %668 = vst.msk [vmem:[#allocation3 + $0x30] sm:$0xff] %vm664_vm6, %v623_v57  ;;  %v431_v58 = vpop.permute.xlu1 %430 }
  0xd5   :  { %475 = vst.msk [vmem:[#allocation3 + $0x40] sm:$0xff] %vm470_vm4, %v431_v58  ;;  %735 = vrot.lane.b32.xlu0 %v2872_v43, %s2443_s15  ;;  %v306_v43 = vld [vmem:[#allocation2 + $0x110] sm:$0xff] }
  0xd6   :  { %543 = vrot.lane.b32.xlu1 %v3079_v41, %s2445_s23 }
  0xd7   :  { %v720_v59 = vpop.permute.xlu0 %719 }
  0xd8   :  { %765 = vst.msk [vmem:[#allocation3 + $0x30] sm:$0xff] %vm761_vm7, %v720_v59  ;;  %v528_v62 = vpop.permute.xlu1 %527  ;;  %v926_v59 = vld [vmem:[#allocation3 + $0x98] sm:$0xff] }
  0xd9   :  { %572 = vst.msk [vmem:[#allocation3 + $0x40] sm:$0xff] %vm567_vm5, %v528_v62  ;;  %832 = vrot.lane.b32.xlu0 %v2949_v10, %s2448_s11 }
  0xda   :  { %640 = vrot.lane.b32.xlu1 %v596_v60, %s2447_s29 }
  0xdb   :  { %v817_v63 = vpop.permute.xlu0 %816 }
  0xdc   :  { %862 = vst.msk [vmem:[#allocation3 + $0x30] sm:$0xff] %vm858_vm8, %v817_v63  ;;  %v625_v1 = vpop.permute.xlu1 %624 }
  0xdd   :  { %669 = vst.msk [vmem:[#allocation3 + $0x40] sm:$0xff] %vm664_vm6, %v625_v1  ;;  %253 = vrot.lane.b32.xlu0 %v2926_v0, %s2444_s20 }
  0xde   :  { %737 = vrot.lane.b32.xlu1 %v2919_v61, %s2443_s15 }
  0xdf   :  { %v238_v5 = vpop.permute.xlu0 %237 }
  0xe0   :  { %281 = vst.msk [vmem:[#allocation3 + $0x50] sm:$0xff] %vm275_vm2, %v238_v5  ;;  %v722_v6 = vpop.permute.xlu1 %721 }
  0xe1   :  { %766 = vst.msk [vmem:[#allocation3 + $0x40] sm:$0xff] %vm761_vm7, %v722_v6  ;;  %351 = vrot.lane.b32.xlu0 %v306_v43, %s2446_s24 }
  0xe2   :  { %834 = vrot.lane.b32.xlu1 %v2961_v3, %s2448_s11 }
  0xe3   :  { %v336_v8 = vpop.permute.xlu0 %335  ;;  %v913_v9 = vld [vmem:[#allocation3 + $0x30] sm:$0xff] }
  0xe4   :  { %379 = vst.msk [vmem:[#allocation3 + $0x50] sm:$0xff] %vm373_vm3, %v336_v8  ;;  %v819_v0 = vpop.permute.xlu1 %818  ;;  %1085 = vmatmul.mubr.f32.gmra.mrb[6].mxu0 %v913_v9 }
  0xe5   :  { %863 = vst.msk [vmem:[#allocation3 + $0x40] sm:$0xff] %vm858_vm8, %v819_v0  ;;  %448 = vrot.lane.b32.xlu0 %v3064_v30, %s2442_s10  ;;  %2347 = vmatprep.mubr.msk.f32.mxu0 %vm26_vm0, %v916_v7  ;;  %v928_v0 = vld [vmem:[#allocation3 + $0xa8] sm:$0xff] }
  0xe6   :  { %255 = vrot.lane.b32.xlu1 %v305_v51, %s2444_s20 }
  0xe7   :  { %v433_v61 = vpop.permute.xlu0 %432 }
  0xe8   :  { %476 = vst.msk [vmem:[#allocation3 + $0x50] sm:$0xff] %vm470_vm4, %v433_v61  ;;  %v240_v11 = vpop.permute.xlu1 %239 }
  0xe9   :  { %282 = vst.msk [vmem:[#allocation3 + $0x60] sm:$0xff] %vm275_vm2, %v240_v11  ;;  %545 = vrot.lane.b32.xlu0 %v3111_v53, %s2445_s23 }
  0xea   :  { %353 = vrot.lane.b32.xlu1 %v307_v2, %s2446_s24 }
  0xeb   :  { %v530_v15 = vpop.permute.xlu0 %529 }
  0xec   :  { %573 = vst.msk [vmem:[#allocation3 + $0x50] sm:$0xff] %vm567_vm5, %v530_v15  ;;  %v338_v18 = vpop.permute.xlu1 %337  ;;  %v915_v19 = vld [vmem:[#allocation3 + $0x40] sm:$0xff] }
  0xed   :  { %380 = vst.msk [vmem:[#allocation3 + $0x60] sm:$0xff] %vm373_vm3, %v338_v18  ;;  %642 = vrot.lane.b32.xlu0 %v597_v13, %s2447_s29  ;;  %1090 = vmatmul.mubr.f32.gmra.mrb[8].mxu0 %v915_v19  ;;  %v930_v18 = vld [vmem:[#allocation3 + $0xb8] sm:$0xff] }
  0xee   :  { %450 = vrot.lane.b32.xlu1 %v3079_v41, %s2442_s10  ;;  %2348 = vmatprep.mubr.msk.f32.mxu0 %vm26_vm0, %v918_v17 }
  0xef   :  { %v627_v20 = vpop.permute.xlu0 %626 }
  0xf0   :  { %670 = vst.msk [vmem:[#allocation3 + $0x50] sm:$0xff] %vm664_vm6, %v627_v20  ;;  %v435_v22 = vpop.permute.xlu1 %434 }
  0xf1   :  { %477 = vst.msk [vmem:[#allocation3 + $0x60] sm:$0xff] %vm470_vm4, %v435_v22  ;;  %739 = vrot.lane.b32.xlu0 %v2949_v10, %s2443_s15  ;;  %v308_v10 = vld [vmem:[#allocation2 + $0x130] sm:$0xff] }
  0xf2   :  { %547 = vrot.lane.b32.xlu1 %v596_v60, %s2445_s23 }
  0xf3   :  { %v724_v23 = vpop.permute.xlu0 %723 }
  0xf4   :  { %767 = vst.msk [vmem:[#allocation3 + $0x50] sm:$0xff] %vm761_vm7, %v724_v23  ;;  %v532_v25 = vpop.permute.xlu1 %531 }
  0xf5   :  { %574 = vst.msk [vmem:[#allocation3 + $0x60] sm:$0xff] %vm567_vm5, %v532_v25  ;;  %836 = vrot.lane.b32.xlu0 %v2980_v12, %s2448_s11 }
  0xf6   :  { %644 = vrot.lane.b32.xlu1 %v598_v24, %s2447_s29 }
  0xf7   :  { %v821_v26 = vpop.permute.xlu0 %820 }
  0xf8   :  { %864 = vst.msk [vmem:[#allocation3 + $0x50] sm:$0xff] %vm858_vm8, %v821_v26  ;;  %v629_v27 = vpop.permute.xlu1 %628 }
  0xf9   :  { %671 = vst.msk [vmem:[#allocation3 + $0x60] sm:$0xff] %vm664_vm6, %v629_v27  ;;  %257 = vrot.lane.b32.xlu0 %v306_v43, %s2444_s20 }
  0xfa   :  { %741 = vrot.lane.b32.xlu1 %v2961_v3, %s2443_s15 }
  0xfb   :  { %v242_v28 = vpop.permute.xlu0 %241 }
  0xfc   :  { %283 = vst.msk [vmem:[#allocation3 + $0x70] sm:$0xff] %vm275_vm2, %v242_v28  ;;  %v726_v30 = vpop.permute.xlu1 %725  ;;  %v932_v28 = vld [vmem:[#allocation3 + $0xc8] sm:$0xff] }
  0xfd   :  { %768 = vst.msk [vmem:[#allocation3 + $0x60] sm:$0xff] %vm761_vm7, %v726_v30  ;;  %355 = vrot.lane.b32.xlu0 %v308_v10, %s2446_s24 }
  0xfe   :  { %838 = vrot.lane.b32.xlu1 %v2991_v14, %s2448_s11 }
  0xff   :  { %v340_v33 = vpop.permute.xlu0 %339  ;;  %v917_v32 = vld [vmem:[#allocation3 + $0x50] sm:$0xff] }
 0x100   :  { %381 = vst.msk [vmem:[#allocation3 + $0x70] sm:$0xff] %vm373_vm3, %v340_v33  ;;  %v823_v3 = vpop.permute.xlu1 %822  ;;  %1095 = vmatmul.mubr.f32.gmra.mrb[10].mxu0 %v917_v32 }
 0x101   :  { %865 = vst.msk [vmem:[#allocation3 + $0x60] sm:$0xff] %vm858_vm8, %v823_v3  ;;  %452 = vrot.lane.b32.xlu0 %v3111_v53, %s2442_s10  ;;  %2349 = vmatprep.mubr.msk.f32.mxu0 %vm26_vm0, %v920_v31  ;;  %v924_v53 = vld [vmem:[#allocation3 + $0x88] sm:$0xff]  ;;  %v934_v3 = vld [vmem:[#allocation3 + $0xd8] sm:$0xff] }
 0x102   :  { %646 = vrot.lane.b32.xlu1 %v599_v35, %s2447_s29 }
 0x103   :  { %v437_v36 = vpop.permute.xlu0 %436 }
 0x104   :  { %478 = vst.msk [vmem:[#allocation3 + $0x70] sm:$0xff] %vm470_vm4, %v437_v36  ;;  %v244_v14 = vpop.permute.xlu1 %243 }
 0x105   :  { %284 = vst.msk [vmem:[#allocation3 + $0x80] sm:$0xff] %vm275_vm2, %v244_v14  ;;  %549 = vrot.lane.b32.xlu0 %v597_v13, %s2445_s23 }
 0x106   :  { %840 = vrot.lane.b32.xlu1 %v3007_v16, %s2448_s11  ;;  %v1782_v16 = vld [vmem:[#allocation4 + $0x2] sm:$0xff] }
 0x107   :  { %v534_v38 = vpop.permute.xlu0 %533 }
 0x108   :  { %575 = vst.msk [vmem:[#allocation3 + $0x70] sm:$0xff] %vm567_vm5, %v534_v38  ;;  %v342_v41 = vpop.permute.xlu1 %341  ;;  %v919_v42 = vld [vmem:[#allocation3 + $0x60] sm:$0xff] }
 0x109   :  { %382 = vst.msk [vmem:[#allocation3 + $0x80] sm:$0xff] %vm373_vm3, %v342_v41  ;;  %743 = vrot.lane.b32.xlu0 %v2980_v12, %s2443_s15  ;;  %1100 = vmatmul.mubr.f32.gmra.mrb[12].mxu0 %v919_v42  ;;  %v1412_v12 = vld [vmem:[#allocation4 + $0x120] sm:$0xff] }
 0x10a   :  { %2350 = vmatprep.mubr.msk.f32.mxu0 %vm26_vm0, %v922_v40  ;;  %1814 = vrot.lane.b32.xlu1 %v1782_v16, %s2443_s15 }
 0x10b   :  { %v631_v44 = vpop.permute.xlu0 %630 }
 0x10c   :  { %672 = vst.msk [vmem:[#allocation3 + $0x70] sm:$0xff] %vm664_vm6, %v631_v44  ;;  %v439_v34 = vpop.permute.xlu1 %438 }
 0x10d   :  { %479 = vst.msk [vmem:[#allocation3 + $0x80] sm:$0xff] %vm470_vm4, %v439_v34  ;;  %1526 = vrot.lane.b32.xlu0 %v1494_v45, %s2442_s10 }
 0x10e   :  { %1458 = vrot.lane.b32.xlu1 %v1412_v12, %s2446_s24 }
 0x10f   :  { %v728_v47 = vpop.permute.xlu0 %727 }
 0x110   :  { %769 = vst.msk [vmem:[#allocation3 + $0x70] sm:$0xff] %vm761_vm7, %v728_v47  ;;  %v536_v48 = vpop.permute.xlu1 %535  ;;  %v936_v47 = vld [vmem:[#allocation3 + $0xe8] sm:$0xff] }
 0x111   :  { %576 = vst.msk [vmem:[#allocation3 + $0x80] sm:$0xff] %vm567_vm5, %v536_v48  ;;  %1528 = vrot.lane.b32.xlu0 %v1495_v49, %s2442_s10 }
 0x113   :  { %v825_v50 = vpop.permute.xlu0 %824 }
 0x114   :  { %866 = vst.msk [vmem:[#allocation3 + $0x70] sm:$0xff] %vm858_vm8, %v825_v50  ;;  %v633_v39 = vpop.permute.xlu1 %632 }
 0x115   :  { %673 = vst.msk [vmem:[#allocation3 + $0x80] sm:$0xff] %vm664_vm6, %v633_v39  ;;  %1816 = vrot.lane.b32.xlu0 %v1783_v37, %s2443_s15 }
 0x117   :  { %v246_v51 = vpop.permute.xlu0 %245 }
 0x118   :  { %285 = vst.msk [vmem:[#allocation3 + $0x90] sm:$0xff] %vm275_vm2, %v246_v51  ;;  %v730_v52 = vpop.permute.xlu1 %729  ;;  %v938_v51 = vld [vmem:[#allocation3 + $0xf8] sm:$0xff] }
 0x119   :  { %770 = vst.msk [vmem:[#allocation3 + $0x80] sm:$0xff] %vm761_vm7, %v730_v52 }
 0x11b   :  { %v344_v54 = vpop.permute.xlu0 %343  ;;  %v921_v55 = vld [vmem:[#allocation3 + $0x70] sm:$0xff] }
 0x11c   :  { %383 = vst.msk [vmem:[#allocation3 + $0x90] sm:$0xff] %vm373_vm3, %v344_v54  ;;  %v827_v56 = vpop.permute.xlu1 %826  ;;  %1105 = vmatmul.mubr.f32.gmra.mrb[14].mxu0 %v921_v55 }
 0x11d   :  { %867 = vst.msk [vmem:[#allocation3 + $0x80] sm:$0xff] %vm858_vm8, %v827_v56  ;;  %2351 = vmatprep.mubr.msk.f32.mxu0 %vm26_vm0, %v924_v53  ;;  %v3270_v56 = vld [vmem:[%s3847_s4] ss:$0 sm:$0xff] }
 0x11f   :  { %v441_v46 = vpop.permute.xlu0 %440 }
 0x120   :  { %480 = vst.msk [vmem:[#allocation3 + $0x90] sm:$0xff] %vm470_vm4, %v441_v46  ;;  %v248_v57 = vpop.permute.xlu1 %247 }
 0x121   :  { %286 = vst.msk [vmem:[#allocation3 + $0xa0] sm:$0xff] %vm275_vm2, %v248_v57  ;;  %v3275_v57 = vld [vmem:[%s3848_s5] ss:$0 sm:$0xff] }
 0x123   :  { %v538_v58 = vpop.permute.xlu0 %537 }
 0x124   :  { %577 = vst.msk [vmem:[#allocation3 + $0x90] sm:$0xff] %vm567_vm5, %v538_v58  ;;  %v346_v60 = vpop.permute.xlu1 %345  ;;  %v923_v62 = vld [vmem:[#allocation3 + $0x80] sm:$0xff] }
 0x125   :  { %384 = vst.msk [vmem:[#allocation3 + $0xa0] sm:$0xff] %vm373_vm3, %v346_v60  ;;  %1110 = vmatmul.mubr.f32.gmra.mrb[16].mxu0 %v923_v62  ;;  %v1269_v62 = vld [vmem:[#allocation4] sm:$0xff] }
 0x126   :  { %2352 = vmatprep.mubr.msk.f32.mxu0 %vm26_vm0, %v926_v59  ;;  %1285 = vst.msk [vmem:[#allocation5] sm:$0xff] %vm26_vm0, %v1269_v62 }
 0x127   :  { %v635_v63 = vpop.permute.xlu0 %634 }
 0x128   :  { %674 = vst.msk [vmem:[#allocation3 + $0x90] sm:$0xff] %vm664_vm6, %v635_v63  ;;  %v443_v1 = vpop.permute.xlu1 %442 }
 0x129   :  { %481 = vst.msk [vmem:[#allocation3 + $0xa0] sm:$0xff] %vm470_vm4, %v443_v1  ;;  %v2038_v1 = vld [vmem:[%s3849_s6] sm:$0xff] }
 0x12b   :  { %v732_v43 = vpop.permute.xlu0 %731 }
 0x12c   :  { %771 = vst.msk [vmem:[#allocation3 + $0x90] sm:$0xff] %vm761_vm7, %v732_v43  ;;  %v540_v5 = vpop.permute.xlu1 %539  ;;  %v2039_v43 = vld [vmem:[%s3849_s6 + $0x8] sm:$0xff] }
 0x12d   :  { %578 = vst.msk [vmem:[#allocation3 + $0xa0] sm:$0xff] %vm567_vm5, %v540_v5  ;;  %v2405_v5 = vpack.c.bf16 %v2039_v43, %v2038_v1 }
 0x12f   :  { %v829_v6 = vpop.permute.xlu0 %828  ;;  %2406 = vmatpush1.bf16.msra.mxu1 %v2405_v5 }
 0x130   :  { %868 = vst.msk [vmem:[#allocation3 + $0x90] sm:$0xff] %vm858_vm8, %v829_v6  ;;  %v637_v7 = vpop.permute.xlu1 %636  ;;  %2407 = vmatprep.subr.bf16.mxu1 %v2441_v4  ;;  %v2040_v6 = vld [vmem:[%s3849_s6 + $0x10] sm:$0xff] }
 0x131   :  { %675 = vst.msk [vmem:[#allocation3 + $0xa0] sm:$0xff] %vm664_vm6, %v637_v7  ;;  %v2041_v7 = vld [vmem:[%s3849_s6 + $0x18] sm:$0xff] }
 0x133   :  { %v250_v8 = vpop.permute.xlu0 %249 }
 0x134   :  { %287 = vst.msk [vmem:[#allocation3 + $0xb0] sm:$0xff] %vm275_vm2, %v250_v8  ;;  %v734_v9 = vpop.permute.xlu1 %733  ;;  %v2408_v8 = vpack.c.bf16 %v2041_v7, %v2040_v6 }
 0x135   :  { %772 = vst.msk [vmem:[#allocation3 + $0xa0] sm:$0xff] %vm761_vm7, %v734_v9 }
 0x136   :  { %2409 = vmatpush1.bf16.msra.mxu1 %v2408_v8 }
 0x137   :  { %v348_v61 = vpop.permute.xlu0 %347  ;;  %v925_v2 = vld [vmem:[#allocation3 + $0x90] sm:$0xff]  ;;  %2410 = vmatprep.subr.bf16.mxu1 %v2441_v4 }
 0x138   :  { %385 = vst.msk [vmem:[#allocation3 + $0xb0] sm:$0xff] %vm373_vm3, %v348_v61  ;;  %v831_v11 = vpop.permute.xlu1 %830  ;;  %1115 = vmatmul.mubr.f32.gmra.mrb[18].mxu0 %v925_v2  ;;  %v2042_v61 = vld [vmem:[%s3849_s6 + $0x20] sm:$0xff]  ;;  %v2043_v2 = vld [vmem:[%s3849_s6 + $0x28] sm:$0xff] }
 0x139   :  { %869 = vst.msk [vmem:[#allocation3 + $0xa0] sm:$0xff] %vm858_vm8, %v831_v11  ;;  %2353 = vmatprep.mubr.msk.f32.mxu0 %vm26_vm0, %v928_v0 }
 0x13b   :  { %v445_v13 = vpop.permute.xlu0 %444 }
 0x13c   :  { %482 = vst.msk [vmem:[#allocation3 + $0xb0] sm:$0xff] %vm470_vm4, %v445_v13  ;;  %v252_v15 = vpop.permute.xlu1 %251  ;;  %v2411_v13 = vpack.c.bf16 %v2043_v2, %v2042_v61 }
 0x13d   :  { %288 = vst.msk [vmem:[#allocation3 + $0xc0] sm:$0xff] %vm275_vm2, %v252_v15  ;;  %v2044_v15 = vld [vmem:[%s3849_s6 + $0x30] sm:$0xff] }
 0x13e   :  { %2412 = vmatpush1.bf16.msra.mxu1 %v2411_v13 }
 0x13f   :  { %v542_v17 = vpop.permute.xlu0 %541  ;;  %2413 = vmatprep.subr.bf16.mxu1 %v2441_v4 }
 0x140   :  { %579 = vst.msk [vmem:[#allocation3 + $0xb0] sm:$0xff] %vm567_vm5, %v542_v17  ;;  %v350_v19 = vpop.permute.xlu1 %349  ;;  %v927_v20 = vld [vmem:[#allocation3 + $0xa0] sm:$0xff]  ;;  %v2045_v17 = vld [vmem:[%s3849_s6 + $0x38] sm:$0xff] }
 0x141   :  { %386 = vst.msk [vmem:[#allocation3 + $0xc0] sm:$0xff] %vm373_vm3, %v350_v19  ;;  %1120 = vmatmul.mubr.f32.gmra.mrb[20].mxu0 %v927_v20  ;;  %v1270_v19 = vld [vmem:[#allocation4 + $0x10] sm:$0xff]  ;;  %v2414_v20 = vpack.c.bf16 %v2045_v17, %v2044_v15 }
 0x142   :  { %2354 = vmatprep.mubr.msk.f32.mxu0 %vm26_vm0, %v930_v18  ;;  %1286 = vst.msk [vmem:[#allocation5 + $0x10] sm:$0xff] %vm26_vm0, %v1270_v19 }
 0x143   :  { %v639_v21 = vpop.permute.xlu0 %638  ;;  %2415 = vmatpush1.bf16.msra.mxu1 %v2414_v20 }
 0x144   :  { %676 = vst.msk [vmem:[#allocation3 + $0xb0] sm:$0xff] %vm664_vm6, %v639_v21  ;;  %v447_v22 = vpop.permute.xlu1 %446  ;;  %2416 = vmatprep.subr.bf16.mxu1 %v2441_v4 }
 0x145   :  { %483 = vst.msk [vmem:[#allocation3 + $0xc0] sm:$0xff] %vm470_vm4, %v447_v22 }
 0x147   :  { %v736_v23 = vpop.permute.xlu0 %735 }
 0x148   :  { %773 = vst.msk [vmem:[#allocation3 + $0xb0] sm:$0xff] %vm761_vm7, %v736_v23  ;;  %v544_v24 = vpop.permute.xlu1 %543 }
 0x149   :  { %580 = vst.msk [vmem:[#allocation3 + $0xc0] sm:$0xff] %vm567_vm5, %v544_v24  ;;  %v2046_v24 = vld [vmem:[%s3849_s6 + $0x40] sm:$0xff] }
 0x14b   :  { %v833_v25 = vpop.permute.xlu0 %832 }
 0x14c   :  { %870 = vst.msk [vmem:[#allocation3 + $0xb0] sm:$0xff] %vm858_vm8, %v833_v25  ;;  %v641_v26 = vpop.permute.xlu1 %640  ;;  %v2047_v25 = vld [vmem:[%s3849_s6 + $0x48] sm:$0xff] }
 0x14d   :  { %677 = vst.msk [vmem:[#allocation3 + $0xc0] sm:$0xff] %vm664_vm6, %v641_v26  ;;  %v2417_v26 = vpack.c.bf16 %v2047_v25, %v2046_v24 }
 0x14f   :  { %v254_v27 = vpop.permute.xlu0 %253  ;;  %2418 = vmatpush1.bf16.msra.mxu1 %v2417_v26 }
 0x150   :  { %289 = vst.msk [vmem:[#allocation3 + $0xd0] sm:$0xff] %vm275_vm2, %v254_v27  ;;  %v738_v10 = vpop.permute.xlu1 %737  ;;  %2419 = vmatprep.subr.bf16.mxu1 %v2441_v4 }
 0x151   :  { %774 = vst.msk [vmem:[#allocation3 + $0xc0] sm:$0xff] %vm761_vm7, %v738_v10  ;;  %v2048_v10 = vld [vmem:[%s3849_s6 + $0x50] sm:$0xff] }
 0x153   :  { %v352_v29 = vpop.permute.xlu0 %351  ;;  %v929_v30 = vld [vmem:[#allocation3 + $0xb0] sm:$0xff] }
 0x154   :  { %387 = vst.msk [vmem:[#allocation3 + $0xd0] sm:$0xff] %vm373_vm3, %v352_v29  ;;  %v835_v31 = vpop.permute.xlu1 %834  ;;  %1125 = vmatmul.mubr.f32.gmra.mrb[22].mxu0 %v929_v30 }
 0x155   :  { %871 = vst.msk [vmem:[#allocation3 + $0xc0] sm:$0xff] %vm858_vm8, %v835_v31  ;;  %2355 = vmatprep.mubr.msk.f32.mxu0 %vm26_vm0, %v932_v28  ;;  %v2049_v28 = vld [vmem:[%s3849_s6 + $0x58] sm:$0xff] }
 0x156   :  { %v2420_v29 = vpack.c.bf16 %v2049_v28, %v2048_v10 }
 0x157   :  { %v449_v33 = vpop.permute.xlu0 %448 }
 0x158   :  { %484 = vst.msk [vmem:[#allocation3 + $0xd0] sm:$0xff] %vm470_vm4, %v449_v33  ;;  %v256_v32 = vpop.permute.xlu1 %255  ;;  %2421 = vmatpush1.bf16.msra.mxu1 %v2420_v29 }
 0x159   :  { %290 = vst.msk [vmem:[#allocation3 + $0xe0] sm:$0xff] %vm275_vm2, %v256_v32  ;;  %v2050_v32 = vld [vmem:[%s3849_s6 + $0x60] sm:$0xff]  ;;  %2422 = vmatprep.subr.bf16.mxu1 %v2441_v4 }
 0x15b   :  { %v546_v35 = vpop.permute.xlu0 %545 }
 0x15c   :  { %581 = vst.msk [vmem:[#allocation3 + $0xd0] sm:$0xff] %vm567_vm5, %v546_v35  ;;  %v354_v36 = vpop.permute.xlu1 %353  ;;  %v931_v14 = vld [vmem:[#allocation3 + $0xc0] sm:$0xff]  ;;  %v2051_v35 = vld [vmem:[%s3849_s6 + $0x68] sm:$0xff] }
 0x15d   :  { %388 = vst.msk [vmem:[#allocation3 + $0xe0] sm:$0xff] %vm373_vm3, %v354_v36  ;;  %1130 = vmatmul.mubr.f32.gmra.mrb[24].mxu0 %v931_v14  ;;  %v2423_v36 = vpack.c.bf16 %v2051_v35, %v2050_v32 }
 0x15e   :  { %2356 = vmatprep.mubr.msk.f32.mxu0 %vm26_vm0, %v934_v3 }
 0x15f   :  { %v643_v38 = vpop.permute.xlu0 %642  ;;  %2424 = vmatpush1.bf16.msra.mxu1 %v2423_v36 }
 0x160   :  { %678 = vst.msk [vmem:[#allocation3 + $0xd0] sm:$0xff] %vm664_vm6, %v643_v38  ;;  %v451_v40 = vpop.permute.xlu1 %450  ;;  %2425 = vmatprep.subr.bf16.mxu1 %v2441_v4 }
 0x161   :  { %485 = vst.msk [vmem:[#allocation3 + $0xe0] sm:$0xff] %vm470_vm4, %v451_v40  ;;  %v2052_v40 = vld [vmem:[%s3849_s6 + $0x70] sm:$0xff] }
 0x163   :  { %v740_v41 = vpop.permute.xlu0 %739 }
 0x164   :  { %775 = vst.msk [vmem:[#allocation3 + $0xd0] sm:$0xff] %vm761_vm7, %v740_v41  ;;  %v548_v42 = vpop.permute.xlu1 %547  ;;  %v2053_v41 = vld [vmem:[%s3849_s6 + $0x78] sm:$0xff] }
 0x165   :  { %582 = vst.msk [vmem:[#allocation3 + $0xe0] sm:$0xff] %vm567_vm5, %v548_v42  ;;  %v2426_v42 = vpack.c.bf16 %v2053_v41, %v2052_v40 }
 0x167   :  { %v837_v44 = vpop.permute.xlu0 %836  ;;  %2427 = vmatpush1.bf16.msra.mxu1 %v2426_v42 }
 0x168   :  { %872 = vst.msk [vmem:[#allocation3 + $0xd0] sm:$0xff] %vm858_vm8, %v837_v44  ;;  %v645_v34 = vpop.permute.xlu1 %644  ;;  %2428 = vmatprep.subr.bf16.mxu1 %v2441_v4 }
 0x169   :  { %679 = vst.msk [vmem:[#allocation3 + $0xe0] sm:$0xff] %vm664_vm6, %v645_v34  ;;  %v2054_v34 = vld [vmem:[%s3849_s6 + $0x80] sm:$0xff] }
 0x16b   :  { %v258_v16 = vpop.permute.xlu0 %257 }
 0x16c   :  { %291 = vst.msk [vmem:[#allocation3 + $0xf0] sm:$0xff] %vm275_vm2, %v258_v16  ;;  %v742_v45 = vpop.permute.xlu1 %741  ;;  %v2055_v16 = vld [vmem:[%s3849_s6 + $0x88] sm:$0xff] }
 0x16d   :  { %776 = vst.msk [vmem:[#allocation3 + $0xe0] sm:$0xff] %vm761_vm7, %v742_v45  ;;  %v2429_v45 = vpack.c.bf16 %v2055_v16, %v2054_v34 }
 0x16f   :  { %v356_v48 = vpop.permute.xlu0 %355  ;;  %v933_v12 = vld [vmem:[#allocation3 + $0xd0] sm:$0xff]  ;;  %2430 = vmatpush1.bf16.msra.mxu1 %v2429_v45 }
 0x170   :  { %389 = vst.msk [vmem:[#allocation3 + $0xf0] sm:$0xff] %vm373_vm3, %v356_v48  ;;  %v839_v49 = vpop.permute.xlu1 %838  ;;  %1135 = vmatmul.mubr.f32.gmra.mrb[26].mxu0 %v933_v12 }
 0x171   :  { %873 = vst.msk [vmem:[#allocation3 + $0xe0] sm:$0xff] %vm858_vm8, %v839_v49  ;;  %2357 = vmatprep.mubr.msk.f32.mxu0 %vm26_vm0, %v936_v47 }
 0x173   :  { %v453_v50 = vpop.permute.xlu0 %452 }
 0x174   :  { %486 = vst.msk [vmem:[#allocation3 + $0xf0] sm:$0xff] %vm470_vm4, %v453_v50  ;;  %v647_v39 = vpop.permute.xlu1 %646 }
 0x177   :  { %v550_v37 = vpop.permute.xlu0 %549 }
 0x178   :  { %583 = vst.msk [vmem:[#allocation3 + $0xf0] sm:$0xff] %vm567_vm5, %v550_v37  ;;  %v935_v52 = vld [vmem:[#allocation3 + $0xe0] sm:$0xff]  ;;  %v841_v53 = vpop.permute.xlu1 %840 }
 0x179   :  { %680 = vst.msk [vmem:[#allocation3 + $0xf0] sm:$0xff] %vm664_vm6, %v647_v39  ;;  %1140 = vmatmul.mubr.f32.gmra.mrb[28].mxu0 %v935_v52 }
 0x17a   :  { %2358 = vmatprep.mubr.msk.f32.mxu0 %vm26_vm0, %v938_v51 }
 0x17b   :  { %v744_v54 = vpop.permute.xlu0 %743 }
 0x17c   :  { %777 = vst.msk [vmem:[#allocation3 + $0xf0] sm:$0xff] %vm761_vm7, %v744_v54  ;;  %v3433_v36 = vpop.permute.xlu1 %1814 }
 0x17d   :  { %874 = vst.msk [vmem:[#allocation3 + $0xf0] sm:$0xff] %vm858_vm8, %v841_v53 }
 0x180   :  { %v3442_v42 = vpop.permute.xlu1 %1458 }
 0x184   :  { %v937_v55 = vld [vmem:[#allocation3 + $0xf0] sm:$0xff] }
 0x185   :  { %1145 = vmatmul.mubr.f32.gmra.mrb[30].mxu0 %v937_v55 }
 0x189   :  { %v1071_v46 = vpop.f32.mrb[0].mxu0 }
 0x18a   :  { %v1157_v58 = vmul.f32 %v3270_v56, %v1071_v46  ;;  %v1073_v59 = vpop.f32.mrb[1].mxu0 }
 0x18c   :  { %v1180_v60 = vadd.f32 %v3275_v57, %v1157_v58 }
 0x18e   :  { %v1196_v63 = vmax.f32 %v1180_v60, 0.0 }
 0x190   :  { %1253 = vst.msk [vmem:[#allocation4 + $0x21] sm:$0xff] %vm26_vm0, %v1196_v63 }
 0x197   :  { %v1590_v9 = vld [vmem:[#allocation4 + $0x21] sm:$0xff] }
 0x198   :  { %v1301_v0 = vld [vmem:[#allocation4 + $0x20] sm:$0xff]  ;;  %1622 = vrot.lane.b32.xlu1 %v1590_v9, %s2445_s23 }
 0x199   :  { %1333 = vrot.lane.b32.xlu0 %v1301_v0, %s2444_s20  ;;  %1287 = vst.msk [vmem:[#allocation5 + $0x20] sm:$0xff] %vm26_vm0, %v1301_v0  ;;  %v1878_v11 = vld [vmem:[#allocation4 + $0x22] sm:$0xff] }
 0x19b   :  { %v1076_v18 = vpop.f32.mrb[2].mxu0 }
 0x19c   :  { %1910 = vrot.lane.b32.xlu1 %v1878_v11, %s2448_s11  ;;  %v1158_v21 = vmul.f32 %v3270_v56, %v1076_v18  ;;  %v1078_v22 = vpop.f32.mrb[3].mxu0 }
 0x19e   :  { %v1181_v23 = vadd.f32 %v3275_v57, %v1158_v21 }
 0x1a0   :  { %1530 = vrot.lane.b32.xlu1 %v1590_v9, %s2442_s10  ;;  %v1197_v27 = vmax.f32 %v1181_v23, 0.0 }
 0x1a2   :  { %1254 = vst.msk [vmem:[#allocation4 + $0x31] sm:$0xff] %vm26_vm0, %v1197_v27  ;;  %v3419_v27 = vpop.permute.xlu0 %1526 }
 0x1a4   :  { %1818 = vrot.lane.b32.xlu1 %v1878_v11, %s2443_s15  ;;  %v1081_v30 = vpop.f32.mrb[4].mxu0 }
 0x1a5   :  { %v1159_v31 = vmul.f32 %v3270_v56, %v1081_v30  ;;  %v1083_v33 = vpop.f32.mrb[5].mxu0 }
 0x1a6   :  { %v3425_v32 = vpop.permute.xlu0 %1528 }
 0x1a7   :  { %v1182_v3 = vadd.f32 %v3275_v57, %v1159_v31 }
 0x1a9   :  { %v1198_v14 = vmax.f32 %v1182_v3, 0.0  ;;  %v1302_v38 = vld [vmem:[#allocation4 + $0x30] sm:$0xff] }
 0x1aa   :  { %1335 = vrot.lane.b32.xlu0 %v1302_v38, %s2444_s20  ;;  %1288 = vst.msk [vmem:[#allocation5 + $0x30] sm:$0xff] %vm26_vm0, %v1302_v38  ;;  %v1591_v44 = vld [vmem:[#allocation4 + $0x31] sm:$0xff] }
 0x1ab   :  { %1255 = vst.msk [vmem:[#allocation4 + $0x41] sm:$0xff] %vm26_vm0, %v1198_v14  ;;  %v1879_v47 = vld [vmem:[#allocation4 + $0x32] sm:$0xff]  ;;  %v3436_v14 = vpop.permute.xlu0 %1816 }
 0x1ae   :  { %1624 = vrot.lane.b32.xlu0 %v1591_v44, %s2445_s23 }
 0x1b2   :  { %1912 = vrot.lane.b32.xlu0 %v1879_v47, %s2448_s11  ;;  %v1398_v48 = vld [vmem:[#allocation4 + $0x40] sm:$0xff] }
 0x1b3   :  { %v1974_v12 = vld [vmem:[#allocation4 + $0x42] sm:$0xff]  ;;  %1430 = vrot.lane.b32.xlu1 %v1398_v48, %s2446_s24  ;;  %1289 = vst.msk [vmem:[#allocation5 + $0x40] sm:$0xff] %vm26_vm0, %v1398_v48 }
 0x1b4   :  { %1990 = vst.msk [vmem:[#allocation5 + $0x8] sm:$0xff] %vm26_vm0, %v1974_v12  ;;  %v1686_v49 = vld [vmem:[#allocation4 + $0x41] sm:$0xff] }
 0x1b6   :  { %1532 = vrot.lane.b32.xlu0 %v1591_v44, %s2442_s10 }
 0x1b7   :  { %1718 = vrot.lane.b32.xlu1 %v1686_v49, %s2447_s29  ;;  %v1086_v50 = vpop.f32.mrb[6].mxu0 }
 0x1b8   :  { %v1160_v4 = vmul.f32 %v3270_v56, %v1086_v50  ;;  %v1088_v39 = vpop.f32.mrb[7].mxu0 }
 0x1ba   :  { %v1183_v37 = vadd.f32 %v3275_v57, %v1160_v4  ;;  %1820 = vrot.lane.b32.xlu0 %v1879_v47, %s2443_s15 }
 0x1bb   :  { %v2007_v51 = vld [vmem:[#allocation5 + $0x8] sm:$0xff]  ;;  %1337 = vrot.lane.b32.xlu1 %v1398_v48, %s2444_s20 }
 0x1bc   :  { %2361 = vmatprep.mubr.msk.f32.mxu1 %vm26_vm0, %v2007_v51  ;;  %v1199_v52 = vmax.f32 %v1183_v37, 0.0 }
 0x1be   :  { %1256 = vst.msk [vmem:[#allocation4 + $0x51] sm:$0xff] %vm26_vm0, %v1199_v52 }
 0x1bf   :  { %1626 = vrot.lane.b32.xlu1 %v1686_v49, %s2445_s23 }
 0x1c0   :  { %v1091_v53 = vpop.f32.mrb[8].mxu0 }
 0x1c1   :  { %v1161_v54 = vmul.f32 %v3270_v56, %v1091_v53  ;;  %v1093_v55 = vpop.f32.mrb[9].mxu0 }
 0x1c3   :  { %v1184_v46 = vadd.f32 %v3275_v57, %v1161_v54  ;;  %1914 = vrot.lane.b32.xlu1 %v1974_v12, %s2448_s11 }
 0x1c5   :  { %v1200_v58 = vmax.f32 %v1184_v46, 0.0  ;;  %v1399_v59 = vld [vmem:[#allocation4 + $0x50] sm:$0xff] }
 0x1c6   :  { %v1881_v60 = vld [vmem:[#allocation4 + $0x52] sm:$0xff]  ;;  %1432 = vrot.lane.b32.xlu0 %v1399_v59, %s2446_s24  ;;  %1290 = vst.msk [vmem:[#allocation5 + $0x50] sm:$0xff] %vm26_vm0, %v1399_v59 }
 0x1c7   :  { %1991 = vst.msk [vmem:[#allocation5 + $0x18] sm:$0xff] %vm26_vm0, %v1881_v60  ;;  %1257 = vst.msk [vmem:[#allocation4 + $0x61] sm:$0xff] %vm26_vm0, %v1200_v58  ;;  %1534 = vrot.lane.b32.xlu1 %v1686_v49, %s2442_s10  ;;  %v1687_v62 = vld [vmem:[#allocation4 + $0x51] sm:$0xff] }
 0x1ca   :  { %1720 = vrot.lane.b32.xlu0 %v1687_v62, %s2447_s29 }
 0x1cb   :  { %1822 = vrot.lane.b32.xlu1 %v1974_v12, %s2443_s15 }
 0x1ce   :  { %1339 = vrot.lane.b32.xlu0 %v1399_v59, %s2444_s20  ;;  %v1400_v63 = vld [vmem:[#allocation4 + $0x60] sm:$0xff] }
 0x1cf   :  { %v1882_v1 = vld [vmem:[#allocation4 + $0x62] sm:$0xff]  ;;  %1434 = vrot.lane.b32.xlu1 %v1400_v63, %s2446_s24  ;;  %1291 = vst.msk [vmem:[#allocation5 + $0x60] sm:$0xff] %vm26_vm0, %v1400_v63 }
 0x1d0   :  { %1992 = vst.msk [vmem:[#allocation5 + $0x28] sm:$0xff] %vm26_vm0, %v1882_v1  ;;  %v1688_v43 = vld [vmem:[#allocation4 + $0x61] sm:$0xff] }
 0x1d2   :  { %1628 = vrot.lane.b32.xlu0 %v1687_v62, %s2445_s23 }
 0x1d3   :  { %1722 = vrot.lane.b32.xlu1 %v1688_v43, %s2447_s29  ;;  %v1096_v5 = vpop.f32.mrb[10].mxu0 }
 0x1d4   :  { %v1162_v6 = vmul.f32 %v3270_v56, %v1096_v5  ;;  %v1098_v7 = vpop.f32.mrb[11].mxu0 }
 0x1d6   :  { %v1185_v8 = vadd.f32 %v3275_v57, %v1162_v6  ;;  %1916 = vrot.lane.b32.xlu0 %v1881_v60, %s2448_s11 }
 0x1d7   :  { %1341 = vrot.lane.b32.xlu1 %v1400_v63, %s2444_s20 }
 0x1d8   :  { %v1201_v9 = vmax.f32 %v1185_v8, 0.0 }
 0x1da   :  { %1258 = vst.msk [vmem:[#allocation4 + $0x71] sm:$0xff] %vm26_vm0, %v1201_v9  ;;  %1536 = vrot.lane.b32.xlu0 %v1687_v62, %s2442_s10 }
 0x1db   :  { %1630 = vrot.lane.b32.xlu1 %v1688_v43, %s2445_s23 }
 0x1dc   :  { %v1101_v0 = vpop.f32.mrb[12].mxu0 }
 0x1dd   :  { %v1163_v61 = vmul.f32 %v3270_v56, %v1101_v0  ;;  %v1103_v2 = vpop.f32.mrb[13].mxu0 }
 0x1de   :  { %1824 = vrot.lane.b32.xlu0 %v1881_v60, %s2443_s15 }
 0x1df   :  { %v1186_v11 = vadd.f32 %v3275_v57, %v1163_v61  ;;  %1918 = vrot.lane.b32.xlu1 %v1882_v1, %s2448_s11 }
 0x1e1   :  { %v1202_v13 = vmax.f32 %v1186_v11, 0.0  ;;  %v1401_v15 = vld [vmem:[#allocation4 + $0x70] sm:$0xff] }
 0x1e2   :  { %v1883_v17 = vld [vmem:[#allocation4 + $0x72] sm:$0xff]  ;;  %1436 = vrot.lane.b32.xlu0 %v1401_v15, %s2446_s24  ;;  %1292 = vst.msk [vmem:[#allocation5 + $0x70] sm:$0xff] %vm26_vm0, %v1401_v15 }
 0x1e3   :  { %1993 = vst.msk [vmem:[#allocation5 + $0x38] sm:$0xff] %vm26_vm0, %v1883_v17  ;;  %1259 = vst.msk [vmem:[#allocation4 + $0x81] sm:$0xff] %vm26_vm0, %v1202_v13  ;;  %1538 = vrot.lane.b32.xlu1 %v1688_v43, %s2442_s10  ;;  %v1689_v18 = vld [vmem:[#allocation4 + $0x71] sm:$0xff] }
 0x1e6   :  { %1724 = vrot.lane.b32.xlu0 %v1689_v18, %s2447_s29 }
 0x1e7   :  { %1826 = vrot.lane.b32.xlu1 %v1882_v1, %s2443_s15 }
 0x1ea   :  { %1343 = vrot.lane.b32.xlu0 %v1401_v15, %s2444_s20  ;;  %v1402_v19 = vld [vmem:[#allocation4 + $0x80] sm:$0xff] }
 0x1eb   :  { %v1884_v20 = vld [vmem:[#allocation4 + $0x82] sm:$0xff]  ;;  %1438 = vrot.lane.b32.xlu1 %v1402_v19, %s2446_s24  ;;  %1293 = vst.msk [vmem:[#allocation5 + $0x80] sm:$0xff] %vm26_vm0, %v1402_v19 }
 0x1ec   :  { %1994 = vst.msk [vmem:[#allocation5 + $0x48] sm:$0xff] %vm26_vm0, %v1884_v20  ;;  %v1690_v21 = vld [vmem:[#allocation4 + $0x81] sm:$0xff] }
 0x1ee   :  { %1632 = vrot.lane.b32.xlu0 %v1689_v18, %s2445_s23 }
 0x1ef   :  { %1726 = vrot.lane.b32.xlu1 %v1690_v21, %s2447_s29  ;;  %v1106_v22 = vpop.f32.mrb[14].mxu0 }
 0x1f0   :  { %v1164_v23 = vmul.f32 %v3270_v56, %v1106_v22  ;;  %v1108_v24 = vpop.f32.mrb[15].mxu0 }
 0x1f2   :  { %v1187_v25 = vadd.f32 %v3275_v57, %v1164_v23  ;;  %1920 = vrot.lane.b32.xlu0 %v1883_v17, %s2448_s11 }
 0x1f3   :  { %1345 = vrot.lane.b32.xlu1 %v1402_v19, %s2444_s20 }
 0x1f4   :  { %v1203_v26 = vmax.f32 %v1187_v25, 0.0 }
 0x1f6   :  { %1260 = vst.msk [vmem:[#allocation4 + $0x91] sm:$0xff] %vm26_vm0, %v1203_v26  ;;  %1540 = vrot.lane.b32.xlu0 %v1689_v18, %s2442_s10 }
 0x1f7   :  { %1634 = vrot.lane.b32.xlu1 %v1690_v21, %s2445_s23 }
 0x1f8   :  { %v1111_v10 = vpop.f32.mrb[16].mxu0 }
 0x1f9   :  { %v1165_v28 = vmul.f32 %v3270_v56, %v1111_v10  ;;  %v1113_v29 = vpop.f32.mrb[17].mxu0 }
 0x1fa   :  { %1828 = vrot.lane.b32.xlu0 %v1883_v17, %s2443_s15 }
 0x1fb   :  { %v1188_v30 = vadd.f32 %v3275_v57, %v1165_v28  ;;  %1922 = vrot.lane.b32.xlu1 %v1884_v20, %s2448_s11 }
 0x1fd   :  { %v1204_v31 = vmax.f32 %v1188_v30, 0.0  ;;  %v1403_v33 = vld [vmem:[#allocation4 + $0x90] sm:$0xff] }
 0x1fe   :  { %v1885_v35 = vld [vmem:[#allocation4 + $0x92] sm:$0xff]  ;;  %1440 = vrot.lane.b32.xlu0 %v1403_v33, %s2446_s24  ;;  %1294 = vst.msk [vmem:[#allocation5 + $0x90] sm:$0xff] %vm26_vm0, %v1403_v33 }
 0x1ff   :  { %1995 = vst.msk [vmem:[#allocation5 + $0x58] sm:$0xff] %vm26_vm0, %v1885_v35  ;;  %1261 = vst.msk [vmem:[#allocation4 + $0xa1] sm:$0xff] %vm26_vm0, %v1204_v31  ;;  %1542 = vrot.lane.b32.xlu1 %v1690_v21, %s2442_s10  ;;  %v1691_v3 = vld [vmem:[#allocation4 + $0x91] sm:$0xff] }
 0x200   :  { %v2009_v21 = vld [vmem:[#allocation5 + $0x18] sm:$0xff] }
 0x202   :  { %1728 = vrot.lane.b32.xlu0 %v1691_v3, %s2447_s29 }
 0x203   :  { %1830 = vrot.lane.b32.xlu1 %v1884_v20, %s2443_s15 }
 0x206   :  { %1347 = vrot.lane.b32.xlu0 %v1403_v33, %s2444_s20  ;;  %v1404_v38 = vld [vmem:[#allocation4 + $0xa0] sm:$0xff] }
 0x207   :  { %v1886_v40 = vld [vmem:[#allocation4 + $0xa2] sm:$0xff]  ;;  %1442 = vrot.lane.b32.xlu1 %v1404_v38, %s2446_s24  ;;  %1295 = vst.msk [vmem:[#allocation5 + $0xa0] sm:$0xff] %vm26_vm0, %v1404_v38 }
 0x208   :  { %1996 = vst.msk [vmem:[#allocation5 + $0x68] sm:$0xff] %vm26_vm0, %v1886_v40  ;;  %v1692_v41 = vld [vmem:[#allocation4 + $0xa1] sm:$0xff] }
 0x20a   :  { %1636 = vrot.lane.b32.xlu0 %v1691_v3, %s2445_s23  ;;  %v1623_v48 = vpop.permute.xlu1 %1622 }
 0x20b   :  { %v1334_v44 = vpop.permute.xlu0 %1333  ;;  %1730 = vrot.lane.b32.xlu1 %v1692_v41, %s2447_s29  ;;  %v1116_v34 = vpop.f32.mrb[18].mxu0 }
 0x20c   :  { %1381 = vst.msk [vmem:[#allocation5] sm:$0xff] %vm275_vm2, %v1334_v44  ;;  %v1166_v16 = vmul.f32 %v3270_v56, %v1116_v34  ;;  %v1118_v45 = vpop.f32.mrb[19].mxu0  ;;  %v2011_v34 = vld [vmem:[#allocation5 + $0x28] sm:$0xff] }
 0x20e   :  { %v1189_v47 = vadd.f32 %v3275_v57, %v1166_v16  ;;  %1924 = vrot.lane.b32.xlu0 %v1885_v35, %s2448_s11  ;;  %v1911_v50 = vpop.permute.xlu1 %1910 }
 0x20f   :  { %1349 = vrot.lane.b32.xlu1 %v1404_v38, %s2444_s20 }
 0x210   :  { %v1205_v12 = vmax.f32 %v1189_v47, 0.0 }
 0x212   :  { %1262 = vst.msk [vmem:[#allocation4 + $0xb1] sm:$0xff] %vm26_vm0, %v1205_v12  ;;  %1544 = vrot.lane.b32.xlu0 %v1691_v3, %s2442_s10  ;;  %v3461_v54 = vpop.permute.xlu1 %1530 }
 0x213   :  { %1638 = vrot.lane.b32.xlu1 %v1692_v41, %s2445_s23 }
 0x214   :  { %v1121_v49 = vpop.f32.mrb[20].mxu0 }
 0x215   :  { %v1167_v4 = vmul.f32 %v3270_v56, %v1121_v49  ;;  %v1123_v39 = vpop.f32.mrb[21].mxu0 }
 0x216   :  { %1832 = vrot.lane.b32.xlu0 %v1885_v35, %s2443_s15  ;;  %v3468_v58 = vpop.permute.xlu1 %1818 }
 0x217   :  { %v1190_v37 = vadd.f32 %v3275_v57, %v1167_v4  ;;  %1926 = vrot.lane.b32.xlu1 %v1886_v40, %s2448_s11 }
 0x219   :  { %v1206_v51 = vmax.f32 %v1190_v37, 0.0  ;;  %v1405_v52 = vld [vmem:[#allocation4 + $0xb0] sm:$0xff] }
 0x21a   :  { %v1887_v53 = vld [vmem:[#allocation4 + $0xb2] sm:$0xff]  ;;  %1444 = vrot.lane.b32.xlu0 %v1405_v52, %s2446_s24  ;;  %1296 = vst.msk [vmem:[#allocation5 + $0xb0] sm:$0xff] %vm26_vm0, %v1405_v52 }
 0x21b   :  { %1997 = vst.msk [vmem:[#allocation5 + $0x78] sm:$0xff] %vm26_vm0, %v1887_v53  ;;  %1263 = vst.msk [vmem:[#allocation4 + $0xc1] sm:$0xff] %vm26_vm0, %v1206_v51  ;;  %1546 = vrot.lane.b32.xlu1 %v1692_v41, %s2442_s10  ;;  %v1693_v46 = vld [vmem:[#allocation4 + $0xb1] sm:$0xff] }
 0x21c   :  { %v1336_v55 = vpop.permute.xlu0 %1335 }
 0x21d   :  { %1382 = vst.msk [vmem:[#allocation5 + $0x10] sm:$0xff] %vm275_vm2, %v1336_v55 }
 0x21e   :  { %1732 = vrot.lane.b32.xlu0 %v1693_v46, %s2447_s29 }
 0x21f   :  { %1834 = vrot.lane.b32.xlu1 %v1886_v40, %s2443_s15 }
 0x220   :  { %v1625_v59 = vpop.permute.xlu0 %1624 }
 0x222   :  { %1351 = vrot.lane.b32.xlu0 %v1405_v52, %s2444_s20  ;;  %v1406_v60 = vld [vmem:[#allocation4 + $0xc0] sm:$0xff]  ;;  %v2013_v52 = vld [vmem:[#allocation5 + $0x38] sm:$0xff] }
 0x223   :  { %v1888_v62 = vld [vmem:[#allocation4 + $0xc2] sm:$0xff]  ;;  %1446 = vrot.lane.b32.xlu1 %v1406_v60, %s2446_s24  ;;  %1297 = vst.msk [vmem:[#allocation5 + $0xc0] sm:$0xff] %vm26_vm0, %v1406_v60 }
 0x224   :  { %1998 = vst.msk [vmem:[#allocation5 + $0x88] sm:$0xff] %vm26_vm0, %v1888_v62  ;;  %v1694_v63 = vld [vmem:[#allocation4 + $0xc1] sm:$0xff]  ;;  %v1913_v5 = vpop.permute.xlu0 %1912 }
 0x225   :  { %v1431_v1 = vpop.permute.xlu1 %1430 }
 0x226   :  { %1478 = vst.msk [vmem:[#allocation5] sm:$0xff] %vm373_vm3, %v1431_v1  ;;  %1640 = vrot.lane.b32.xlu0 %v1693_v46, %s2445_s23 }
 0x227   :  { %1574 = vst.msk [vmem:[#allocation5] sm:$0xff] %vm470_vm4, %v3419_v27  ;;  %1734 = vrot.lane.b32.xlu1 %v1694_v63, %s2447_s29  ;;  %v1126_v43 = vpop.f32.mrb[22].mxu0 }
 0x228   :  { %1670 = vst.msk [vmem:[#allocation5] sm:$0xff] %vm567_vm5, %v1623_v48  ;;  %v1168_v6 = vmul.f32 %v3270_v56, %v1126_v43  ;;  %v1128_v7 = vpop.f32.mrb[23].mxu0  ;;  %v3489_v2 = vpop.permute.xlu0 %1532 }
 0x229   :  { %v1719_v8 = vpop.permute.xlu1 %1718 }
 0x22a   :  { %v1191_v9 = vadd.f32 %v3275_v57, %v1168_v6  ;;  %1766 = vst.msk [vmem:[#allocation5] sm:$0xff] %vm664_vm6, %v1719_v8  ;;  %1928 = vrot.lane.b32.xlu0 %v1887_v53, %s2448_s11 }
 0x22b   :  { %1862 = vst.msk [vmem:[#allocation5] sm:$0xff] %vm761_vm7, %v3433_v36  ;;  %1353 = vrot.lane.b32.xlu1 %v1406_v60, %s2444_s20 }
 0x22c   :  { %v1207_v0 = vmax.f32 %v1191_v9, 0.0  ;;  %1958 = vst.msk [vmem:[#allocation5] sm:$0xff] %vm858_vm8, %v1911_v50  ;;  %v3498_v20 = vpop.permute.xlu0 %1820 }
 0x22d   :  { %v1338_v61 = vpop.permute.xlu1 %1337 }
 0x22e   :  { %1264 = vst.msk [vmem:[#allocation4 + $0xd1] sm:$0xff] %vm26_vm0, %v1207_v0  ;;  %1548 = vrot.lane.b32.xlu0 %v1693_v46, %s2442_s10 }
 0x22f   :  { %1383 = vst.msk [vmem:[#allocation5 + $0x20] sm:$0xff] %vm275_vm2, %v1338_v61  ;;  %1642 = vrot.lane.b32.xlu1 %v1694_v63, %s2445_s23 }
 0x230   :  { %v1131_v11 = vpop.f32.mrb[24].mxu0 }
 0x231   :  { %v1169_v13 = vmul.f32 %v3270_v56, %v1131_v11  ;;  %v1627_v15 = vpop.permute.xlu1 %1626  ;;  %v1133_v17 = vpop.f32.mrb[25].mxu0 }
 0x232   :  { %1836 = vrot.lane.b32.xlu0 %v1887_v53, %s2443_s15  ;;  %v1988_v17 = vld [vmem:[#allocation4 + $0x122] sm:$0xff] }
 0x233   :  { %v1192_v18 = vadd.f32 %v3275_v57, %v1169_v13  ;;  %1930 = vrot.lane.b32.xlu1 %v1888_v62, %s2448_s11  ;;  %v2006_v19 = vld [vmem:[#allocation5] sm:$0xff]  ;;  %v2015_v13 = vld [vmem:[#allocation5 + $0x48] sm:$0xff]  ;;  %2004 = vst.msk [vmem:[#allocation5 + $0xe8] sm:$0xff] %vm26_vm0, %v1988_v17 }
 0x234   :  { %2185 = vmatmul.mubr.f32.vlgmr.msra.gmra.mrb[0].mxu1 %v2006_v19 }
 0x235   :  { %v1208_v22 = vmax.f32 %v1192_v18, 0.0  ;;  %v1915_v23 = vpop.permute.xlu1 %1914  ;;  %2362 = vmatprep.mubr.msk.f32.mxu1 %vm26_vm0, %v2009_v21  ;;  %v1407_v24 = vld [vmem:[#allocation4 + $0xd0] sm:$0xff] }
 0x236   :  { %v1889_v25 = vld [vmem:[#allocation4 + $0xd2] sm:$0xff]  ;;  %1448 = vrot.lane.b32.xlu0 %v1407_v24, %s2446_s24  ;;  %1298 = vst.msk [vmem:[#allocation5 + $0xd0] sm:$0xff] %vm26_vm0, %v1407_v24 }
 0x237   :  { %1999 = vst.msk [vmem:[#allocation5 + $0x98] sm:$0xff] %vm26_vm0, %v1889_v25  ;;  %1265 = vst.msk [vmem:[#allocation4 + $0xe1] sm:$0xff] %vm26_vm0, %v1208_v22  ;;  %1550 = vrot.lane.b32.xlu1 %v1694_v63, %s2442_s10  ;;  %v1695_v10 = vld [vmem:[#allocation4 + $0xd1] sm:$0xff]  ;;  %v1700_v22 = vld [vmem:[#allocation4 + $0x121] sm:$0xff] }
 0x238   :  { %v1433_v26 = vpop.permute.xlu0 %1432 }
 0x239   :  { %1479 = vst.msk [vmem:[#allocation5 + $0x10] sm:$0xff] %vm373_vm3, %v1433_v26  ;;  %v3507_v27 = vpop.permute.xlu1 %1534 }
 0x23a   :  { %1575 = vst.msk [vmem:[#allocation5 + $0x10] sm:$0xff] %vm470_vm4, %v3425_v32  ;;  %1736 = vrot.lane.b32.xlu0 %v1695_v10, %s2447_s29 }
 0x23b   :  { %1671 = vst.msk [vmem:[#allocation5 + $0x10] sm:$0xff] %vm567_vm5, %v1625_v59  ;;  %1838 = vrot.lane.b32.xlu1 %v1888_v62, %s2443_s15 }
 0x23c   :  { %v1721_v28 = vpop.permute.xlu0 %1720 }
 0x23d   :  { %1767 = vst.msk [vmem:[#allocation5 + $0x10] sm:$0xff] %vm664_vm6, %v1721_v28  ;;  %v3515_v29 = vpop.permute.xlu1 %1822 }
 0x23e   :  { %1863 = vst.msk [vmem:[#allocation5 + $0x10] sm:$0xff] %vm761_vm7, %v3436_v14  ;;  %1355 = vrot.lane.b32.xlu0 %v1407_v24, %s2444_s20  ;;  %v1408_v30 = vld [vmem:[#allocation4 + $0xe0] sm:$0xff] }
 0x23f   :  { %v3520_v31 = vld [vmem:[#allocation4 + $0xe2] sm:$0xff]  ;;  %1959 = vst.msk [vmem:[#allocation5 + $0x10] sm:$0xff] %vm858_vm8, %v1913_v5  ;;  %1450 = vrot.lane.b32.xlu1 %v1408_v30, %s2446_s24 }
 0x240   :  { %2000 = vst.msk [vmem:[#allocation5 + $0xa8] sm:$0xff] %vm26_vm0, %v3520_v31  ;;  %1299 = vst.msk [vmem:[#allocation5 + $0xe0] sm:$0xff] %vm26_vm0, %v1408_v30  ;;  %v1340_v33 = vpop.permute.xlu0 %1339  ;;  %v1696_v32 = vld [vmem:[#allocation4 + $0xe1] sm:$0xff] }
 0x241   :  { %1384 = vst.msk [vmem:[#allocation5 + $0x30] sm:$0xff] %vm275_vm2, %v1340_v33  ;;  %v1435_v35 = vpop.permute.xlu1 %1434  ;;  %v1989_v33 = vld [vmem:[#allocation4 + $0x132] sm:$0xff] }
 0x242   :  { %1480 = vst.msk [vmem:[#allocation5 + $0x20] sm:$0xff] %vm373_vm3, %v1435_v35  ;;  %1644 = vrot.lane.b32.xlu0 %v1695_v10, %s2445_s23 }
 0x243   :  { %1576 = vst.msk [vmem:[#allocation5 + $0x20] sm:$0xff] %vm470_vm4, %v3461_v54  ;;  %1738 = vrot.lane.b32.xlu1 %v1696_v32, %s2447_s29  ;;  %v1136_v3 = vpop.f32.mrb[26].mxu0 }
 0x244   :  { %1672 = vst.msk [vmem:[#allocation5 + $0x20] sm:$0xff] %vm567_vm5, %v1627_v15  ;;  %v1170_v36 = vmul.f32 %v3270_v56, %v1136_v3  ;;  %v1629_v14 = vpop.permute.xlu0 %1628  ;;  %v1138_v38 = vpop.f32.mrb[27].mxu0 }
 0x245   :  { %v1723_v40 = vpop.permute.xlu1 %1722  ;;  %2005 = vst.msk [vmem:[#allocation5 + $0xf8] sm:$0xff] %vm26_vm0, %v1989_v33 }
 0x246   :  { %v1193_v41 = vadd.f32 %v3275_v57, %v1170_v36  ;;  %1768 = vst.msk [vmem:[#allocation5 + $0x20] sm:$0xff] %vm664_vm6, %v1723_v40  ;;  %1932 = vrot.lane.b32.xlu0 %v1889_v25, %s2448_s11  ;;  %v2008_v44 = vld [vmem:[#allocation5 + $0x10] sm:$0xff] }
 0x247   :  { %1864 = vst.msk [vmem:[#allocation5 + $0x20] sm:$0xff] %vm761_vm7, %v3468_v58  ;;  %2190 = vmatmul.mubr.f32.gmra.mrb[2].mxu1 %v2008_v44  ;;  %1357 = vrot.lane.b32.xlu1 %v1408_v30, %s2444_s20 }
 0x248   :  { %v1209_v16 = vmax.f32 %v1193_v41, 0.0  ;;  %1960 = vst.msk [vmem:[#allocation5 + $0x20] sm:$0xff] %vm858_vm8, %v1915_v23  ;;  %v1917_v45 = vpop.permute.xlu0 %1916  ;;  %2363 = vmatprep.mubr.msk.f32.mxu1 %vm26_vm0, %v2011_v34  ;;  %v2019_v41 = vld [vmem:[#allocation5 + $0x68] sm:$0xff] }
 0x249   :  { %v1342_v47 = vpop.permute.xlu1 %1341 }
 0x24a   :  { %1266 = vst.msk [vmem:[#allocation4 + $0xf1] sm:$0xff] %vm26_vm0, %v1209_v16  ;;  %1552 = vrot.lane.b32.xlu0 %v1695_v10, %s2442_s10 }
 0x24b   :  { %1385 = vst.msk [vmem:[#allocation5 + $0x40] sm:$0xff] %vm275_vm2, %v1342_v47  ;;  %1646 = vrot.lane.b32.xlu1 %v1696_v32, %s2445_s23 }
 0x24c   :  { %v3547_v48 = vpop.permute.xlu0 %1536  ;;  %v1141_v12 = vpop.f32.mrb[28].mxu0 }
 0x24d   :  { %v1171_v49 = vmul.f32 %v3270_v56, %v1141_v12  ;;  %v1631_v50 = vpop.permute.xlu1 %1630  ;;  %v1143_v4 = vpop.f32.mrb[29].mxu0  ;;  %v2021_v12 = vld [vmem:[#allocation5 + $0x78] sm:$0xff] }
 0x24e   :  { %1840 = vrot.lane.b32.xlu0 %v1889_v25, %s2443_s15 }
 0x24f   :  { %v1194_v39 = vadd.f32 %v3275_v57, %v1171_v49  ;;  %1934 = vrot.lane.b32.xlu1 %v3520_v31, %s2448_s11  ;;  %v2010_v37 = vld [vmem:[#allocation5 + $0x20] sm:$0xff] }
 0x250   :  { %v3554_v51 = vpop.permute.xlu0 %1824  ;;  %2195 = vmatmul.mubr.f32.gmra.mrb[4].mxu1 %v2010_v37 }
 0x251   :  { %v1210_v53 = vmax.f32 %v1194_v39, 0.0  ;;  %v1919_v54 = vpop.permute.xlu1 %1918  ;;  %2364 = vmatprep.mubr.msk.f32.mxu1 %vm26_vm0, %v2013_v52  ;;  %v1409_v55 = vld [vmem:[#allocation4 + $0xf0] sm:$0xff] }
 0x252   :  { %v3557_v46 = vld [vmem:[#allocation4 + $0xf2] sm:$0xff]  ;;  %1452 = vrot.lane.b32.xlu0 %v1409_v55, %s2446_s24  ;;  %1300 = vst.msk [vmem:[#allocation5 + $0xf0] sm:$0xff] %vm26_vm0, %v1409_v55 }
 0x253   :  { %2001 = vst.msk [vmem:[#allocation5 + $0xb8] sm:$0xff] %vm26_vm0, %v3557_v46  ;;  %1267 = vst.msk [vmem:[#allocation4 + $0x101] sm:$0xff] %vm26_vm0, %v1210_v53  ;;  %1554 = vrot.lane.b32.xlu1 %v1696_v32, %s2442_s10  ;;  %v3568_v60 = vld [vmem:[#allocation4 + $0xf1] sm:$0xff] }
 0x254   :  { %v1437_v58 = vpop.permute.xlu0 %1436  ;;  %v1701_v32 = vld [vmem:[#allocation4 + $0x131] sm:$0xff] }
 0x255   :  { %1481 = vst.msk [vmem:[#allocation5 + $0x30] sm:$0xff] %vm373_vm3, %v1437_v58  ;;  %v3566_v59 = vpop.permute.xlu1 %1538 }
 0x256   :  { %1577 = vst.msk [vmem:[#allocation5 + $0x30] sm:$0xff] %vm470_vm4, %v3489_v2  ;;  %1740 = vrot.lane.b32.xlu0 %v3568_v60, %s2447_s29 }
 0x257   :  { %1673 = vst.msk [vmem:[#allocation5 + $0x30] sm:$0xff] %vm567_vm5, %v1629_v14 }
 0x258   :  { %v1725_v62 = vpop.permute.xlu0 %1724  ;;  %v1146_v63 = vpop.f32.mrb[30].mxu0 }
 0x259   :  { %1769 = vst.msk [vmem:[#allocation5 + $0x30] sm:$0xff] %vm664_vm6, %v1725_v62  ;;  %v1172_v1 = vmul.f32 %v3270_v56, %v1146_v63  ;;  %v3577_v43 = vpop.permute.xlu1 %1826  ;;  %v1148_v5 = vpop.f32.mrb[31].mxu0 }
 0x25a   :  { %1865 = vst.msk [vmem:[#allocation5 + $0x30] sm:$0xff] %vm761_vm7, %v3498_v20  ;;  %1359 = vrot.lane.b32.xlu0 %v1409_v55, %s2444_s20  ;;  %v1410_v6 = vld [vmem:[#allocation4 + $0x100] sm:$0xff] }
 0x25b   :  { %v1892_v7 = vld [vmem:[#allocation4 + $0x102] sm:$0xff]  ;;  %1961 = vst.msk [vmem:[#allocation5 + $0x30] sm:$0xff] %vm858_vm8, %v1917_v45  ;;  %v1195_v8 = vadd.f32 %v3275_v57, %v1172_v1  ;;  %1454 = vrot.lane.b32.xlu1 %v1410_v6, %s2446_s24 }
 0x25c   :  { %2002 = vst.msk [vmem:[#allocation5 + $0xc8] sm:$0xff] %vm26_vm0, %v1892_v7  ;;  %v1344_v9 = vpop.permute.xlu0 %1343  ;;  %v1698_v56 = vld [vmem:[#allocation4 + $0x101] sm:$0xff] }
 0x25d   :  { %v1211_v0 = vmax.f32 %v1195_v8, 0.0  ;;  %1386 = vst.msk [vmem:[#allocation5 + $0x50] sm:$0xff] %vm275_vm2, %v1344_v9  ;;  %v1439_v61 = vpop.permute.xlu1 %1438 }
 0x25e   :  { %1482 = vst.msk [vmem:[#allocation5 + $0x40] sm:$0xff] %vm373_vm3, %v1439_v61  ;;  %1648 = vrot.lane.b32.xlu0 %v3568_v60, %s2445_s23 }
 0x25f   :  { %1268 = vst.msk [vmem:[#allocation4 + $0x111] sm:$0xff] %vm26_vm0, %v1211_v0  ;;  %1742 = vrot.lane.b32.xlu1 %v1698_v56, %s2447_s29 }
 0x260   :  { %1578 = vst.msk [vmem:[#allocation5 + $0x40] sm:$0xff] %vm470_vm4, %v3507_v27  ;;  %v1633_v57 = vpop.permute.xlu0 %1632  ;;  %v2017_v27 = vld [vmem:[#allocation5 + $0x58] sm:$0xff] }
 0x261   :  { %1674 = vst.msk [vmem:[#allocation5 + $0x40] sm:$0xff] %vm567_vm5, %v1631_v50  ;;  %v1727_v2 = vpop.permute.xlu1 %1726 }
 0x262   :  { %1770 = vst.msk [vmem:[#allocation5 + $0x40] sm:$0xff] %vm664_vm6, %v1727_v2  ;;  %1936 = vrot.lane.b32.xlu0 %v3557_v46, %s2448_s11  ;;  %v2012_v11 = vld [vmem:[#allocation5 + $0x30] sm:$0xff] }
 0x263   :  { %1866 = vst.msk [vmem:[#allocation5 + $0x40] sm:$0xff] %vm761_vm7, %v3515_v29  ;;  %2200 = vmatmul.mubr.f32.gmra.mrb[6].mxu1 %v2012_v11  ;;  %1361 = vrot.lane.b32.xlu1 %v1410_v6, %s2444_s20  ;;  %v1413_v29 = vld [vmem:[#allocation4 + $0x130] sm:$0xff]  ;;  %v2027_v11 = vld [vmem:[#allocation5 + $0xa8] sm:$0xff] }
 0x264   :  { %1962 = vst.msk [vmem:[#allocation5 + $0x40] sm:$0xff] %vm858_vm8, %v1919_v54  ;;  %v1921_v15 = vpop.permute.xlu0 %1920  ;;  %2365 = vmatprep.mubr.msk.f32.mxu1 %vm26_vm0, %v2015_v13 }
 0x265   :  { %v1346_v18 = vpop.permute.xlu1 %1345 }
 0x266   :  { %1387 = vst.msk [vmem:[#allocation5 + $0x60] sm:$0xff] %vm275_vm2, %v1346_v18  ;;  %v1411_v19 = vld [vmem:[#allocation4 + $0x110] sm:$0xff] }
 0x267   :  { %v1893_v20 = vld [vmem:[#allocation4 + $0x112] sm:$0xff]  ;;  %1650 = vrot.lane.b32.xlu1 %v1698_v56, %s2445_s23  ;;  %1456 = vrot.lane.b32.xlu0 %v1411_v19, %s2446_s24 }
 0x268   :  { %2003 = vst.msk [vmem:[#allocation5 + $0xd8] sm:$0xff] %vm26_vm0, %v1893_v20  ;;  %v3608_v21 = vpop.permute.xlu0 %1540  ;;  %v1699_v24 = vld [vmem:[#allocation4 + $0x111] sm:$0xff] }
 0x269   :  { %v1635_v23 = vpop.permute.xlu1 %1634 }
 0x26b   :  { %1746 = vrot.lane.b32.xlu1 %v1700_v22, %s2447_s29  ;;  %1744 = vrot.lane.b32.xlu0 %v1699_v24, %s2447_s29  ;;  %v2014_v25 = vld [vmem:[#allocation5 + $0x40] sm:$0xff] }
 0x26c   :  { %v1829_v26 = vpop.permute.xlu0 %1828  ;;  %2205 = vmatmul.mubr.f32.gmra.mrb[8].mxu1 %v2014_v25 }
 0x26d   :  { %v1923_v10 = vpop.permute.xlu1 %1922  ;;  %2366 = vmatprep.mubr.msk.f32.mxu1 %vm26_vm0, %v2017_v27 }
 0x26f   :  { %1842 = vrot.lane.b32.xlu1 %v3520_v31, %s2443_s15  ;;  %1363 = vrot.lane.b32.xlu0 %v1411_v19, %s2444_s20 }
 0x270   :  { %v1441_v28 = vpop.permute.xlu0 %1440 }
 0x271   :  { %1483 = vst.msk [vmem:[#allocation5 + $0x50] sm:$0xff] %vm373_vm3, %v1441_v28  ;;  %v1543_v30 = vpop.permute.xlu1 %1542 }
 0x272   :  { %1579 = vst.msk [vmem:[#allocation5 + $0x50] sm:$0xff] %vm470_vm4, %v3547_v48 }
 0x273   :  { %1675 = vst.msk [vmem:[#allocation5 + $0x50] sm:$0xff] %vm567_vm5, %v1633_v57  ;;  %1938 = vrot.lane.b32.xlu1 %v1892_v7, %s2448_s11  ;;  %1460 = vrot.lane.b32.xlu0 %v1413_v29, %s2446_s24 }
 0x274   :  { %v1729_v31 = vpop.permute.xlu0 %1728 }
 0x275   :  { %1771 = vst.msk [vmem:[#allocation5 + $0x50] sm:$0xff] %vm664_vm6, %v1729_v31  ;;  %v1831_v35 = vpop.permute.xlu1 %1830 }
 0x276   :  { %1867 = vst.msk [vmem:[#allocation5 + $0x50] sm:$0xff] %vm761_vm7, %v3554_v51 }
 0x277   :  { %1963 = vst.msk [vmem:[#allocation5 + $0x50] sm:$0xff] %vm858_vm8, %v1921_v15  ;;  %1748 = vrot.lane.b32.xlu1 %v1701_v32, %s2447_s29  ;;  %1556 = vrot.lane.b32.xlu0 %v3568_v60, %s2442_s10 }
 0x278   :  { %v1348_v3 = vpop.permute.xlu0 %1347 }
 0x279   :  { %1388 = vst.msk [vmem:[#allocation5 + $0x70] sm:$0xff] %vm275_vm2, %v1348_v3  ;;  %v1443_v36 = vpop.permute.xlu1 %1442 }
 0x27a   :  { %1484 = vst.msk [vmem:[#allocation5 + $0x60] sm:$0xff] %vm373_vm3, %v1443_v36  ;;  %v2033_v36 = vld [vmem:[#allocation5 + $0xd8] sm:$0xff] }
 0x27b   :  { %1580 = vst.msk [vmem:[#allocation5 + $0x60] sm:$0xff] %vm470_vm4, %v3566_v59  ;;  %1940 = vrot.lane.b32.xlu1 %v1893_v20, %s2448_s11  ;;  %1652 = vrot.lane.b32.xlu0 %v1699_v24, %s2445_s23 }
 0x27c   :  { %1676 = vst.msk [vmem:[#allocation5 + $0x60] sm:$0xff] %vm567_vm5, %v1635_v23  ;;  %v1637_v14 = vpop.permute.xlu0 %1636 }
 0x27d   :  { %v1731_v38 = vpop.permute.xlu1 %1730 }
 0x27e   :  { %1772 = vst.msk [vmem:[#allocation5 + $0x60] sm:$0xff] %vm664_vm6, %v1731_v38  ;;  %v2016_v40 = vld [vmem:[#allocation5 + $0x50] sm:$0xff] }
 0x27f   :  { %1868 = vst.msk [vmem:[#allocation5 + $0x60] sm:$0xff] %vm761_vm7, %v3577_v43  ;;  %2210 = vmatmul.mubr.f32.gmra.mrb[10].mxu1 %v2016_v40  ;;  %1844 = vrot.lane.b32.xlu0 %v3557_v46, %s2443_s15  ;;  %v2023_v46 = vld [vmem:[#allocation5 + $0x88] sm:$0xff]  ;;  %v2025_v43 = vld [vmem:[#allocation5 + $0x98] sm:$0xff] }
 0x280   :  { %1964 = vst.msk [vmem:[#allocation5 + $0x60] sm:$0xff] %vm858_vm8, %v1923_v10  ;;  %v1925_v44 = vpop.permute.xlu0 %1924  ;;  %2367 = vmatprep.mubr.msk.f32.mxu1 %vm26_vm0, %v2019_v41 }
 0x281   :  { %v1350_v34 = vpop.permute.xlu1 %1349 }
 0x282   :  { %1389 = vst.msk [vmem:[#allocation5 + $0x80] sm:$0xff] %vm275_vm2, %v1350_v34  ;;  %v2035_v34 = vld [vmem:[#allocation5 + $0xe8] sm:$0xff] }
 0x284   :  { %v1545_v16 = vpop.permute.xlu0 %1544 }
 0x285   :  { %v1639_v45 = vpop.permute.xlu1 %1638 }
 0x287   :  { %v2018_v47 = vld [vmem:[#allocation5 + $0x60] sm:$0xff] }
 0x288   :  { %v1833_v48 = vpop.permute.xlu0 %1832  ;;  %2215 = vmatmul.mubr.f32.gmra.mrb[12].mxu1 %v2018_v47 }
 0x289   :  { %v1927_v49 = vpop.permute.xlu1 %1926  ;;  %2368 = vmatprep.mubr.msk.f32.mxu1 %vm26_vm0, %v2021_v12 }
 0x28c   :  { %v1445_v50 = vpop.permute.xlu0 %1444 }
 0x28d   :  { %1485 = vst.msk [vmem:[#allocation5 + $0x70] sm:$0xff] %vm373_vm3, %v1445_v50  ;;  %v1547_v4 = vpop.permute.xlu1 %1546 }
 0x28e   :  { %1581 = vst.msk [vmem:[#allocation5 + $0x70] sm:$0xff] %vm470_vm4, %v3608_v21  ;;  %v2029_v21 = vld [vmem:[#allocation5 + $0xb8] sm:$0xff] }
 0x28f   :  { %1677 = vst.msk [vmem:[#allocation5 + $0x70] sm:$0xff] %vm567_vm5, %v1637_v14 }
 0x290   :  { %v1733_v39 = vpop.permute.xlu0 %1732 }
 0x291   :  { %1773 = vst.msk [vmem:[#allocation5 + $0x70] sm:$0xff] %vm664_vm6, %v1733_v39  ;;  %v1835_v37 = vpop.permute.xlu1 %1834 }
 0x292   :  { %1869 = vst.msk [vmem:[#allocation5 + $0x70] sm:$0xff] %vm761_vm7, %v1829_v26 }
 0x293   :  { %1965 = vst.msk [vmem:[#allocation5 + $0x70] sm:$0xff] %vm858_vm8, %v1925_v44 }
 0x294   :  { %v1352_v51 = vpop.permute.xlu0 %1351 }
 0x295   :  { %1390 = vst.msk [vmem:[#allocation5 + $0x90] sm:$0xff] %vm275_vm2, %v1352_v51  ;;  %v1447_v52 = vpop.permute.xlu1 %1446 }
 0x296   :  { %1486 = vst.msk [vmem:[#allocation5 + $0x80] sm:$0xff] %vm373_vm3, %v1447_v52 }
 0x297   :  { %1582 = vst.msk [vmem:[#allocation5 + $0x80] sm:$0xff] %vm470_vm4, %v1543_v30  ;;  %v2031_v30 = vld [vmem:[#allocation5 + $0xc8] sm:$0xff] }
 0x298   :  { %1678 = vst.msk [vmem:[#allocation5 + $0x80] sm:$0xff] %vm567_vm5, %v1639_v45  ;;  %v1641_v53 = vpop.permute.xlu0 %1640 }
 0x299   :  { %v1735_v54 = vpop.permute.xlu1 %1734 }
 0x29a   :  { %1774 = vst.msk [vmem:[#allocation5 + $0x80] sm:$0xff] %vm664_vm6, %v1735_v54  ;;  %v2020_v55 = vld [vmem:[#allocation5 + $0x70] sm:$0xff]  ;;  %v2057_v54 = vld [vmem:[%s3843_s0 + $0x8] sm:$0xff] }
 0x29b   :  { %1870 = vst.msk [vmem:[#allocation5 + $0x80] sm:$0xff] %vm761_vm7, %v1831_v35  ;;  %2220 = vmatmul.mubr.f32.gmra.mrb[14].mxu1 %v2020_v55 }
 0x29c   :  { %1966 = vst.msk [vmem:[#allocation5 + $0x80] sm:$0xff] %vm858_vm8, %v1927_v49  ;;  %v1929_v58 = vpop.permute.xlu0 %1928  ;;  %2369 = vmatprep.mubr.msk.f32.mxu1 %vm26_vm0, %v2023_v46 }
 0x29d   :  { %v1354_v59 = vpop.permute.xlu1 %1353 }
 0x29e   :  { %1391 = vst.msk [vmem:[#allocation5 + $0xa0] sm:$0xff] %vm275_vm2, %v1354_v59  ;;  %v2058_v59 = vld [vmem:[%s3843_s0 + $0x10] sm:$0xff] }
 0x2a0   :  { %v1549_v60 = vpop.permute.xlu0 %1548 }
 0x2a1   :  { %v1643_v62 = vpop.permute.xlu1 %1642 }
 0x2a3   :  { %v2022_v63 = vld [vmem:[#allocation5 + $0x80] sm:$0xff] }
 0x2a4   :  { %v1837_v1 = vpop.permute.xlu0 %1836  ;;  %2225 = vmatmul.mubr.f32.gmra.mrb[16].mxu1 %v2022_v63 }
 0x2a5   :  { %v1931_v5 = vpop.permute.xlu1 %1930  ;;  %2370 = vmatprep.mubr.msk.f32.mxu1 %vm26_vm0, %v2025_v43 }
 0x2a8   :  { %v1449_v6 = vpop.permute.xlu0 %1448 }
 0x2a9   :  { %1487 = vst.msk [vmem:[#allocation5 + $0x90] sm:$0xff] %vm373_vm3, %v1449_v6  ;;  %v1551_v7 = vpop.permute.xlu1 %1550 }
 0x2aa   :  { %1583 = vst.msk [vmem:[#allocation5 + $0x90] sm:$0xff] %vm470_vm4, %v1545_v16 }
 0x2ab   :  { %1679 = vst.msk [vmem:[#allocation5 + $0x90] sm:$0xff] %vm567_vm5, %v1641_v53 }
 0x2ac   :  { %v1737_v8 = vpop.permute.xlu0 %1736 }
 0x2ad   :  { %1775 = vst.msk [vmem:[#allocation5 + $0x90] sm:$0xff] %vm664_vm6, %v1737_v8  ;;  %v1839_v9 = vpop.permute.xlu1 %1838 }
 0x2ae   :  { %1871 = vst.msk [vmem:[#allocation5 + $0x90] sm:$0xff] %vm761_vm7, %v1833_v48  ;;  %v2037_v48 = vld [vmem:[#allocation5 + $0xf8] sm:$0xff] }
 0x2af   :  { %1967 = vst.msk [vmem:[#allocation5 + $0x90] sm:$0xff] %vm858_vm8, %v1929_v58 }
 0x2b0   :  { %v1356_v56 = vpop.permute.xlu0 %1355 }
 0x2b1   :  { %1392 = vst.msk [vmem:[#allocation5 + $0xb0] sm:$0xff] %vm275_vm2, %v1356_v56  ;;  %v1451_v0 = vpop.permute.xlu1 %1450 }
 0x2b2   :  { %1488 = vst.msk [vmem:[#allocation5 + $0xa0] sm:$0xff] %vm373_vm3, %v1451_v0  ;;  %v2061_v0 = vld [vmem:[%s3843_s0 + $0x28] sm:$0xff] }
 0x2b3   :  { %1584 = vst.msk [vmem:[#allocation5 + $0xa0] sm:$0xff] %vm470_vm4, %v1547_v4 }
 0x2b4   :  { %1680 = vst.msk [vmem:[#allocation5 + $0xa0] sm:$0xff] %vm567_vm5, %v1643_v62  ;;  %v1645_v61 = vpop.permute.xlu0 %1644 }
 0x2b5   :  { %v1739_v57 = vpop.permute.xlu1 %1738 }
 0x2b6   :  { %1776 = vst.msk [vmem:[#allocation5 + $0xa0] sm:$0xff] %vm664_vm6, %v1739_v57  ;;  %v2024_v2 = vld [vmem:[#allocation5 + $0x90] sm:$0xff] }
 0x2b7   :  { %1872 = vst.msk [vmem:[#allocation5 + $0xa0] sm:$0xff] %vm761_vm7, %v1835_v37  ;;  %2230 = vmatmul.mubr.f32.gmra.mrb[18].mxu1 %v2024_v2  ;;  %v2056_v37 = vld [vmem:[%s3843_s0] sm:$0xff] }
 0x2b8   :  { %1968 = vst.msk [vmem:[#allocation5 + $0xa0] sm:$0xff] %vm858_vm8, %v1931_v5  ;;  %v1933_v13 = vpop.permute.xlu0 %1932  ;;  %2371 = vmatprep.mubr.msk.f32.mxu1 %vm26_vm0, %v2027_v11  ;;  %v2062_v11 = vld [vmem:[%s3843_s0 + $0x30] sm:$0xff] }
 0x2b9   :  { %v1358_v15 = vpop.permute.xlu1 %1357 }
 0x2ba   :  { %1393 = vst.msk [vmem:[#allocation5 + $0xc0] sm:$0xff] %vm275_vm2, %v1358_v15 }
 0x2bc   :  { %v1553_v17 = vpop.permute.xlu0 %1552 }
 0x2bd   :  { %v1647_v18 = vpop.permute.xlu1 %1646 }
 0x2bf   :  { %v2026_v19 = vld [vmem:[#allocation5 + $0xa0] sm:$0xff] }
 0x2c0   :  { %v1841_v20 = vpop.permute.xlu0 %1840  ;;  %2235 = vmatmul.mubr.f32.gmra.mrb[20].mxu1 %v2026_v19 }
 0x2c1   :  { %2372 = vmatprep.mubr.msk.f32.mxu1 %vm26_vm0, %v2029_v21  ;;  %v1935_v22 = vpop.permute.xlu1 %1934 }
 0x2c4   :  { %v1453_v23 = vpop.permute.xlu0 %1452 }
 0x2c5   :  { %1489 = vst.msk [vmem:[#allocation5 + $0xb0] sm:$0xff] %vm373_vm3, %v1453_v23  ;;  %v1555_v25 = vpop.permute.xlu1 %1554 }
 0x2c6   :  { %1585 = vst.msk [vmem:[#allocation5 + $0xb0] sm:$0xff] %vm470_vm4, %v1549_v60 }
 0x2c7   :  { %1681 = vst.msk [vmem:[#allocation5 + $0xb0] sm:$0xff] %vm567_vm5, %v1645_v61 }
 0x2c8   :  { %v1741_v24 = vpop.permute.xlu0 %1740 }
 0x2c9   :  { %1777 = vst.msk [vmem:[#allocation5 + $0xb0] sm:$0xff] %vm664_vm6, %v1741_v24 }
 0x2ca   :  { %1873 = vst.msk [vmem:[#allocation5 + $0xb0] sm:$0xff] %vm761_vm7, %v1837_v1  ;;  %v2059_v1 = vld [vmem:[%s3843_s0 + $0x18] sm:$0xff] }
 0x2cb   :  { %1969 = vst.msk [vmem:[#allocation5 + $0xb0] sm:$0xff] %vm858_vm8, %v1933_v13 }
 0x2cc   :  { %v1360_v26 = vpop.permute.xlu0 %1359 }
 0x2cd   :  { %1394 = vst.msk [vmem:[#allocation5 + $0xd0] sm:$0xff] %vm275_vm2, %v1360_v26  ;;  %v1455_v27 = vpop.permute.xlu1 %1454  ;;  %v2065_v26 = vld [vmem:[%s3843_s0 + $0x48] sm:$0xff] }
 0x2ce   :  { %1490 = vst.msk [vmem:[#allocation5 + $0xc0] sm:$0xff] %vm373_vm3, %v1455_v27 }
 0x2cf   :  { %1586 = vst.msk [vmem:[#allocation5 + $0xc0] sm:$0xff] %vm470_vm4, %v1551_v7  ;;  %v2060_v7 = vld [vmem:[%s3843_s0 + $0x20] sm:$0xff] }
 0x2d0   :  { %1682 = vst.msk [vmem:[#allocation5 + $0xc0] sm:$0xff] %vm567_vm5, %v1647_v18  ;;  %v1649_v10 = vpop.permute.xlu0 %1648  ;;  %v2063_v18 = vld [vmem:[%s3843_s0 + $0x38] sm:$0xff] }
 0x2d1   :  { %v1743_v28 = vpop.permute.xlu1 %1742 }
 0x2d2   :  { %1778 = vst.msk [vmem:[#allocation5 + $0xc0] sm:$0xff] %vm664_vm6, %v1743_v28  ;;  %v2028_v29 = vld [vmem:[#allocation5 + $0xb0] sm:$0xff] }
 0x2d3   :  { %1874 = vst.msk [vmem:[#allocation5 + $0xc0] sm:$0xff] %vm761_vm7, %v1839_v9  ;;  %2240 = vmatmul.mubr.f32.gmra.mrb[22].mxu1 %v2028_v29  ;;  %v2066_v29 = vld [vmem:[%s3843_s0 + $0x50] sm:$0xff] }
 0x2d4   :  { %1970 = vst.msk [vmem:[#allocation5 + $0xc0] sm:$0xff] %vm858_vm8, %v1935_v22  ;;  %v1937_v33 = vpop.permute.xlu0 %1936  ;;  %2373 = vmatprep.mubr.msk.f32.mxu1 %vm26_vm0, %v2031_v30  ;;  %v2064_v22 = vld [vmem:[%s3843_s0 + $0x40] sm:$0xff] }
 0x2d5   :  { %v1362_v31 = vpop.permute.xlu1 %1361 }
 0x2d6   :  { %1395 = vst.msk [vmem:[#allocation5 + $0xe0] sm:$0xff] %vm275_vm2, %v1362_v31 }
 0x2d7   :  { %1492 = vst.msk [vmem:[#allocation5 + $0xe0] sm:$0xff] %vm373_vm3, %v3442_v42 }
 0x2d8   :  { %1588 = vst.msk [vmem:[#allocation5 + $0xe0] sm:$0xff] %vm470_vm4, %v1555_v25 }
 0x2d9   :  { %v1651_v32 = vpop.permute.xlu1 %1650  ;;  %v1457_v35 = vpop.permute.xlu0 %1456 }
 0x2da   :  { %1684 = vst.msk [vmem:[#allocation5 + $0xe0] sm:$0xff] %vm567_vm5, %v1651_v32 }
 0x2db   :  { %1491 = vst.msk [vmem:[#allocation5 + $0xd0] sm:$0xff] %vm373_vm3, %v1457_v35  ;;  %v2030_v3 = vld [vmem:[#allocation5 + $0xc0] sm:$0xff]  ;;  %v2067_v35 = vld [vmem:[%s3843_s0 + $0x58] sm:$0xff] }
 0x2dc   :  { %1587 = vst.msk [vmem:[#allocation5 + $0xd0] sm:$0xff] %vm470_vm4, %v1553_v17  ;;  %2245 = vmatmul.mubr.f32.gmra.mrb[24].mxu1 %v2030_v3 }
 0x2dd   :  { %1683 = vst.msk [vmem:[#allocation5 + $0xd0] sm:$0xff] %vm567_vm5, %v1649_v10  ;;  %v1747_v14 = vpop.permute.xlu1 %1746  ;;  %2374 = vmatprep.mubr.msk.f32.mxu1 %vm26_vm0, %v2033_v36  ;;  %v1745_v38 = vpop.permute.xlu0 %1744 }
 0x2de   :  { %1780 = vst.msk [vmem:[#allocation5 + $0xe0] sm:$0xff] %vm664_vm6, %v1747_v14  ;;  %1779 = vst.msk [vmem:[#allocation5 + $0xd0] sm:$0xff] %vm664_vm6, %v1745_v38 }
 0x2df   :  { %1875 = vst.msk [vmem:[#allocation5 + $0xd0] sm:$0xff] %vm761_vm7, %v1841_v20 }
 0x2e0   :  { %1971 = vst.msk [vmem:[#allocation5 + $0xd0] sm:$0xff] %vm858_vm8, %v1937_v33 }
 0x2e1   :  { %v1843_v42 = vpop.permute.xlu1 %1842  ;;  %v1364_v40 = vpop.permute.xlu0 %1363 }
 0x2e2   :  { %1876 = vst.msk [vmem:[#allocation5 + $0xe0] sm:$0xff] %vm761_vm7, %v1843_v42  ;;  %v2068_v42 = vld [vmem:[%s3843_s0 + $0x60] sm:$0xff] }
 0x2e3   :  { %1396 = vst.msk [vmem:[#allocation5 + $0xf0] sm:$0xff] %vm275_vm2, %v1364_v40 }
 0x2e5   :  { %v1939_v41 = vpop.permute.xlu1 %1938  ;;  %v1461_v44 = vpop.permute.xlu0 %1460 }
 0x2e6   :  { %1972 = vst.msk [vmem:[#allocation5 + $0xe0] sm:$0xff] %vm858_vm8, %v1939_v41 }
 0x2e7   :  { %1493 = vst.msk [vmem:[#allocation5 + $0xf0] sm:$0xff] %vm373_vm3, %v1461_v44  ;;  %v2032_v16 = vld [vmem:[#allocation5 + $0xd0] sm:$0xff] }
 0x2e8   :  { %2250 = vmatmul.mubr.f32.gmra.mrb[26].mxu1 %v2032_v16  ;;  %v2069_v16 = vld [vmem:[%s3843_s0 + $0x68] sm:$0xff] }
 0x2e9   :  { %v1557_v45 = vpop.permute.xlu0 %1556  ;;  %2375 = vmatprep.mubr.msk.f32.mxu1 %vm26_vm0, %v2035_v34  ;;  %v1749_v47 = vpop.permute.xlu1 %1748 }
 0x2ea   :  { %1589 = vst.msk [vmem:[#allocation5 + $0xf0] sm:$0xff] %vm470_vm4, %v1557_v45 }
 0x2ed   :  { %v1653_v12 = vpop.permute.xlu0 %1652  ;;  %v2034_v49 = vld [vmem:[#allocation5 + $0xe0] sm:$0xff]  ;;  %v1941_v4 = vpop.permute.xlu1 %1940 }
 0x2ee   :  { %1685 = vst.msk [vmem:[#allocation5 + $0xf0] sm:$0xff] %vm567_vm5, %v1653_v12  ;;  %2255 = vmatmul.mubr.f32.gmra.mrb[28].mxu1 %v2034_v49  ;;  %v2070_v12 = vld [vmem:[%s3843_s0 + $0x70] sm:$0xff] }
 0x2ef   :  { %1781 = vst.msk [vmem:[#allocation5 + $0xf0] sm:$0xff] %vm664_vm6, %v1749_v47  ;;  %2376 = vmatprep.mubr.msk.f32.mxu1 %vm26_vm0, %v2037_v48 }
 0x2f1   :  { %v1845_v50 = vpop.permute.xlu0 %1844 }
 0x2f2   :  { %1877 = vst.msk [vmem:[#allocation5 + $0xf0] sm:$0xff] %vm761_vm7, %v1845_v50 }
 0x2f3   :  { %1973 = vst.msk [vmem:[#allocation5 + $0xf0] sm:$0xff] %vm858_vm8, %v1941_v4 }
 0x2fa   :  { %v2036_v39 = vld [vmem:[#allocation5 + $0xf0] sm:$0xff] }
 0x2fb   :  { %2260 = vmatmul.mubr.f32.gmra.mrb[30].mxu1 %v2036_v39 }
 0x307   :  { %v2186_v51 = vpop.f32.mrb[0].mxu1 }
 0x308   :  { %v2187_v52 = vadd.f32 %v2186_v51, %v2056_v37  ;;  %v2188_v53 = vpop.f32.mrb[1].mxu1  ;;  %v2071_v37 = vld [vmem:[%s3843_s0 + $0x78] sm:$0xff] }
 0x30a   :  { %2265 = vst.msk [vmem:[%s3850_s7] sm:$0xff] %vm26_vm0, %v2187_v52 }
 0x31a   :  { %v2191_v55 = vpop.f32.mrb[2].mxu1 }
 0x31b   :  { %v2192_v46 = vadd.f32 %v2191_v55, %v2057_v54  ;;  %v2193_v58 = vpop.f32.mrb[3].mxu1 }
 0x31d   :  { %2266 = vst.msk [vmem:[%s3850_s7 + $0x8] sm:$0xff] %vm26_vm0, %v2192_v46 }
 0x323   :  { %v2196_v60 = vpop.f32.mrb[4].mxu1 }
 0x324   :  { %v2197_v62 = vadd.f32 %v2196_v60, %v2058_v59  ;;  %v2198_v63 = vpop.f32.mrb[5].mxu1 }
 0x326   :  { %2269 = vrot.lane.b32.xlu0 %v2197_v62, %s2444_s20 }
 0x336   :  { %v2201_v43 = vpop.f32.mrb[6].mxu1 }
 0x337   :  { %v2202_v5 = vadd.f32 %v2201_v43, %v2059_v1  ;;  %v2203_v6 = vpop.f32.mrb[7].mxu1 }
 0x339   :  { %2271 = vrot.lane.b32.xlu1 %v2202_v5, %s2444_s20 }
 0x33f   :  { %v2206_v8 = vpop.f32.mrb[8].mxu1 }
 0x340   :  { %v2207_v9 = vadd.f32 %v2206_v8, %v2060_v7  ;;  %v2208_v56 = vpop.f32.mrb[9].mxu1 }
 0x342   :  { %2279 = vrot.lane.b32.xlu0 %v2207_v9, %s2446_s24 }
 0x352   :  { %v2211_v61 = vpop.f32.mrb[10].mxu1 }
 0x353   :  { %v2212_v57 = vadd.f32 %v2211_v61, %v2061_v0  ;;  %v2213_v2 = vpop.f32.mrb[11].mxu1 }
 0x355   :  { %2281 = vrot.lane.b32.xlu1 %v2212_v57, %s2446_s24 }
 0x35b   :  { %v2216_v13 = vpop.f32.mrb[12].mxu1 }
 0x35c   :  { %v2217_v15 = vadd.f32 %v2216_v13, %v2062_v11  ;;  %v2218_v17 = vpop.f32.mrb[13].mxu1 }
 0x35e   :  { %2289 = vrot.lane.b32.xlu0 %v2217_v15, %s2442_s10 }
 0x36e   :  { %v2221_v19 = vpop.f32.mrb[14].mxu1 }
 0x36f   :  { %v2222_v20 = vadd.f32 %v2221_v19, %v2063_v18  ;;  %v2223_v21 = vpop.f32.mrb[15].mxu1 }
 0x371   :  { %2291 = vrot.lane.b32.xlu1 %v2222_v20, %s2442_s10 }
 0x377   :  { %v2226_v23 = vpop.f32.mrb[16].mxu1 }
 0x378   :  { %v2227_v24 = vadd.f32 %v2226_v23, %v2064_v22  ;;  %v2228_v25 = vpop.f32.mrb[17].mxu1 }
 0x37a   :  { %2299 = vrot.lane.b32.xlu0 %v2227_v24, %s2445_s23 }
 0x38a   :  { %v2231_v27 = vpop.f32.mrb[18].mxu1 }
 0x38b   :  { %v2232_v10 = vadd.f32 %v2231_v27, %v2065_v26  ;;  %v2233_v28 = vpop.f32.mrb[19].mxu1 }
 0x38d   :  { %2301 = vrot.lane.b32.xlu1 %v2232_v10, %s2445_s23 }
 0x393   :  { %v2236_v30 = vpop.f32.mrb[20].mxu1 }
 0x394   :  { %v2237_v33 = vadd.f32 %v2236_v30, %v2066_v29  ;;  %v2238_v31 = vpop.f32.mrb[21].mxu1 }
 0x396   :  { %2309 = vrot.lane.b32.xlu0 %v2237_v33, %s2447_s29 }
 0x398   :  { %v2270_v32 = vpop.permute.xlu0 %2269 }
 0x399   :  { %2275 = vst.msk [vmem:[%s3850_s7] sm:$0xff] %vm275_vm2, %v2270_v32 }
 0x3a6   :  { %v2241_v3 = vpop.f32.mrb[22].mxu1 }
 0x3a7   :  { %v2242_v36 = vadd.f32 %v2241_v3, %v2067_v35  ;;  %v2243_v14 = vpop.f32.mrb[23].mxu1 }
 0x3a9   :  { %2311 = vrot.lane.b32.xlu1 %v2242_v36, %s2447_s29 }
 0x3ab   :  { %v2272_v38 = vpop.permute.xlu1 %2271 }
 0x3ac   :  { %2276 = vst.msk [vmem:[%s3850_s7 + $0x8] sm:$0xff] %vm275_vm2, %v2272_v38 }
 0x3af   :  { %v2246_v40 = vpop.f32.mrb[24].mxu1 }
 0x3b0   :  { %v2247_v41 = vadd.f32 %v2246_v40, %v2068_v42  ;;  %v2248_v44 = vpop.f32.mrb[25].mxu1 }
 0x3b2   :  { %2319 = vrot.lane.b32.xlu0 %v2247_v41, %s2443_s15 }
 0x3b4   :  { %v2280_v34 = vpop.permute.xlu0 %2279 }
 0x3b5   :  { %2285 = vst.msk [vmem:[%s3850_s7] sm:$0xff] %vm373_vm3, %v2280_v34 }
 0x3bb   :  { %v2251_v45 = vpop.f32.mrb[26].mxu1 }
 0x3bc   :  { %v2252_v47 = vadd.f32 %v2251_v45, %v2069_v16  ;;  %v2253_v48 = vpop.f32.mrb[27].mxu1 }
 0x3be   :  { %2321 = vrot.lane.b32.xlu1 %v2252_v47, %s2443_s15 }
 0x3c1   :  { %v2256_v49 = vpop.f32.mrb[28].mxu1 }
 0x3c2   :  { %v2257_v50 = vadd.f32 %v2256_v49, %v2070_v12  ;;  %v2258_v4 = vpop.f32.mrb[29].mxu1 }
 0x3c4   :  { %2329 = vrot.lane.b32.xlu0 %v2257_v50, %s2448_s11 }
 0x3c7   :  { %v2282_v39 = vpop.permute.xlu1 %2281 }
 0x3c8   :  { %2286 = vst.msk [vmem:[%s3850_s7 + $0x8] sm:$0xff] %vm373_vm3, %v2282_v39 }
 0x3ce   :  { %v2261_v51 = vpop.f32.mrb[30].mxu1 }
 0x3cf   :  { %v2262_v52 = vadd.f32 %v2261_v51, %v2071_v37  ;;  %v2263_v53 = vpop.f32.mrb[31].mxu1 }
 0x3d0   :  { %v2290_v54 = vpop.permute.xlu0 %2289 }
 0x3d1   :  { %2295 = vst.msk [vmem:[%s3850_s7] sm:$0xff] %vm470_vm4, %v2290_v54  ;;  %2331 = vrot.lane.b32.xlu1 %v2262_v52, %s2448_s11 }
 0x3e3   :  { %v2292_v55 = vpop.permute.xlu1 %2291 }
 0x3e4   :  { %2296 = vst.msk [vmem:[%s3850_s7 + $0x8] sm:$0xff] %vm470_vm4, %v2292_v55 }
 0x3ec   :  { %v2300_v46 = vpop.permute.xlu0 %2299 }
 0x3ed   :  { %2305 = vst.msk [vmem:[%s3850_s7] sm:$0xff] %vm567_vm5, %v2300_v46 }
 0x3ff   :  { %v2302_v58 = vpop.permute.xlu1 %2301 }
 0x400   :  { %2306 = vst.msk [vmem:[%s3850_s7 + $0x8] sm:$0xff] %vm567_vm5, %v2302_v58 }
 0x408   :  { %v2310_v59 = vpop.permute.xlu0 %2309 }
 0x409   :  { %2315 = vst.msk [vmem:[%s3850_s7] sm:$0xff] %vm664_vm6, %v2310_v59 }
 0x41b   :  { %v2312_v60 = vpop.permute.xlu1 %2311 }
 0x41c   :  { %2316 = vst.msk [vmem:[%s3850_s7 + $0x8] sm:$0xff] %vm664_vm6, %v2312_v60 }
 0x424   :  { %v2320_v62 = vpop.permute.xlu0 %2319 }
 0x425   :  { %2325 = vst.msk [vmem:[%s3850_s7] sm:$0xff] %vm761_vm7, %v2320_v62 }
 0x430   :  { %v2322_v63 = vpop.permute.xlu1 %2321 }
 0x431   :  { %2326 = vst.msk [vmem:[%s3850_s7 + $0x8] sm:$0xff] %vm761_vm7, %v2322_v63 }
 0x436   :  { %v2330_v1 = vpop.permute.xlu0 %2329 }
 0x437   :  { %2335 = vst.msk [vmem:[%s3850_s7] sm:$0xff] %vm858_vm8, %v2330_v1 }
 0x443   :  { %v2332_v43 = vpop.permute.xlu1 %2331 }
 0x444   :  { %2336 = vst.msk [vmem:[%s3850_s7 + $0x8] sm:$0xff] %vm858_vm8, %v2332_v43 }

</bundles_post_ra>
